<compile_context>
chip_gen: v7x
topology: tpu7x:2x2x1
jax: 0.10.0
libtpu: 0.0.40
codegen_flags: <defaults>
</compile_context>

<pallas_src>
import jax
import jax.numpy as jnp
import numpy as np
from jax.experimental import pallas as pl
from jax.experimental.pallas import tpu as pltpu

NUM_CLASSES = 10
H1P = 128           # fc1 hidden, lane-padded (50 real)


# ------------------------------ Pallas kernel ------------------------------ #

def fused_net_kernel(x_ref, w1_ref, b1_ref, w2_ref, b2_ref,
                     wf1_ref, bf1_ref, wf2_ref, bf2_ref, o_ref):
    """Full Net forward for one batch tile.

    x_ref  : (4, 7, TB, 28) image rows split by (row mod 4); lanes = width
    w1_ref : (5, 28, 256)   conv1 banded weights, cols = (wpar*128 + pw*10 + c)
    b1_ref : (1, 128)       conv1 bias tiled over pooled width (lane pw*10+c)
    w2_ref : (640, 256)     conv2 banded weights, rows = ki*128 + w*10 + ci
    b2_ref : (1, 128)       conv2 bias tiled (lane pw*20 + co)
    wf1_ref: (512, 128)     fc1 weights, rows = ph*128 + pw*20 + co (PyTorch
                            view(-1,320) (C,H,W) order folded in at pack time)
    bf1_ref: (1, 128)
    wf2_ref: (128, 128)     fc2 (50x10 real, zero padded)
    bf2_ref: (1, 128)
    o_ref  : (TB, 128)      log-probabilities (first 10 lanes valid)
    """
    tb = o_ref.shape[0]
    cdt = w1_ref.dtype                      # MXU operand dtype (f32 or bf16)
    x = x_ref[...]                          # (4, 7, tb, 28) f32

    # ---- conv1 + 2x2 maxpool + bias + ReLU (5 banded matmuls, one per ki) ---
    # Row blocks: combo = 2*hp + a; rows inside a block are (h2, b);
    # pooled output row = 2*h2 + hp, pre-pool conv row = 4*h2 + 2*hp + a.
    y1 = None
    for ki in range(5):
        parts = []
        for hp in range(2):
            for a in range(2):
                q, r = divmod(2 * hp + a + ki, 4)        # image row = 4*(h2+q)+r
                parts.append(x[r, q:q + 6, :, :])        # (6, tb, 28)
        lhs = jnp.concatenate(parts, axis=0).reshape(24 * tb, 28)  # layout no-op
        t = jnp.dot(lhs.astype(cdt), w1_ref[ki],
                    preferred_element_type=jnp.float32)  # (24*tb, 256)
        y1 = t if y1 is None else y1 + t

    m1 = 6 * tb

    def _pool_w1(i):                                     # max over width parity
        blk = y1[i * m1:(i + 1) * m1, :]
        return jnp.maximum(blk[:, :128], blk[:, 128:])

    # p[hp]: (6*tb, 128) = relu(maxpool(conv1)+b1); rows (h2, b); lanes w*10+ci
    p = [jnp.maximum(jnp.maximum(_pool_w1(2 * hp), _pool_w1(2 * hp + 1))
                     + b1_ref[...], 0.0)
         for hp in range(2)]

    # ---- conv2 + 2x2 maxpool + bias + ReLU (single matmul, K = 5*128) -------
    # Dropout2d: identity in eval mode.
    rows_a = []
    for a in range(2):
        pieces = []
        for ki in range(5):
            d, par = divmod(a + ki, 2)                   # input row = 2*(oh2+d)+par
            pieces.append(p[par][d * tb:(d + 4) * tb, :])          # (4*tb, 128)
        rows_a.append(jnp.concatenate(pieces, axis=1))             # (4*tb, 640)
    lhs2 = jnp.concatenate(rows_a, axis=0)                         # (8*tb, 640)
    y2 = jnp.dot(lhs2.astype(cdt), w2_ref[...],
                 preferred_element_type=jnp.float32)               # (8*tb, 256)
    m2 = 4 * tb
    z = [jnp.maximum(y2[a * m2:(a + 1) * m2, :128],
                     y2[a * m2:(a + 1) * m2, 128:]) for a in range(2)]
    # q2: (4*tb, 128), rows (oh2, b), lanes pw*20+co, lanes>=80 are zero
    q2 = jnp.maximum(jnp.maximum(z[0], z[1]) + b2_ref[...], 0.0)

    # ---- fc1 (single packed-K matmul) + ReLU --------------------------------
    qf = jnp.concatenate([q2[i * tb:(i + 1) * tb, :] for i in range(4)],
                         axis=1)                                   # (tb, 512)
    h = jnp.dot(qf.astype(cdt), wf1_ref[...],
                preferred_element_type=jnp.float32)
    h = jnp.maximum(h + bf1_ref[...], 0.0)
    # F.dropout: identity in eval mode.

    # ---- fc2 + masked log_softmax ------------------------------------------
    logits = (jnp.dot(h.astype(cdt), wf2_ref[...],
                      preferred_element_type=jnp.float32) + bf2_ref[...])
    lane = jax.lax.broadcasted_iota(jnp.int32, logits.shape, 1)
    logits = jnp.where(lane < NUM_CLASSES, logits, -1e30)
    mx = jnp.max(logits, axis=-1, keepdims=True)
    s = logits - mx
    o_ref[...] = s - jnp.log(jnp.sum(jnp.exp(s), axis=-1, keepdims=True))


# ---------------------------- weight pre-packing ---------------------------- #

def pack_params(params, compute_dtype=jnp.float32):
    """Fold conv banding, pooling column order and the PyTorch flatten order
    into padded, lane-dense weight slabs.  Run once (outside the hot path)."""
    f32 = jnp.float32
    w1 = jnp.asarray(params["w_conv1"], f32)     # (10, 1, 5, 5)  OIHW
    w2 = jnp.asarray(params["w_conv2"], f32)     # (20, 10, 5, 5) OIHW
    wf1 = jnp.asarray(params["w_fc1"], f32)      # (320, 50) = torch weight.T
    wf2 = jnp.asarray(params["w_fc2"], f32)      # (50, 10)
    b1 = jnp.asarray(params["b_conv1"], f32)
    b2 = jnp.asarray(params["b_conv2"], f32)
    bf1 = jnp.asarray(params["b_fc1"], f32)
    bf2 = jnp.asarray(params["b_fc2"], f32)

    # conv1 banded weights: W1b[ki, 2*pw+wp+kj, wp*128 + pw*10 + c] = w1[c,0,ki,kj]
    ki, kj, wp, pw, c = np.meshgrid(np.arange(5), np.arange(5), np.arange(2),
                                    np.arange(12), np.arange(10), indexing="ij")
    w1b = (jnp.zeros((5, 28, 256), f32)
           .at[ki, 2 * pw + wp + kj, wp * 128 + pw * 10 + c]
           .set(w1[c, 0, ki, kj]))

    # conv2 banded weights:
    # W2b[ki*128 + (2*pw+wp+kj)*10 + ci, wp*128 + pw*20 + co] = w2[co,ci,ki,kj]
    ki, kj, wp, pw, co, ci = np.meshgrid(np.arange(5), np.arange(5), np.arange(2),
                                         np.arange(4), np.arange(20), np.arange(10),
                                         indexing="ij")
    w2b = (jnp.zeros((640, 256), f32)
           .at[ki * 128 + (2 * pw + wp + kj) * 10 + ci, wp * 128 + pw * 20 + co]
           .set(w2[co, ci, ki, kj]))

    # fc1: PyTorch flatten index co*16 + ph*4 + pw  ->  rows ph*128 + pw*20 + co
    wf1f = wf1.reshape(20, 4, 4, 50).transpose(1, 2, 0, 3).reshape(4, 80, 50)
    wf1p = (jnp.zeros((4, 128, H1P), f32).at[:, :80, :50].set(wf1f)
            .reshape(4 * 128, H1P))
    wf2p = jnp.zeros((H1P, 128), f32).at[:50, :NUM_CLASSES].set(wf2)

    return {
        "w1": w1b.astype(compute_dtype),
        "b1": jnp.zeros((1, 128), f32).at[0, :120].set(jnp.tile(b1, 12)),
        "w2": w2b.astype(compute_dtype),
        "b2": jnp.zeros((1, 128), f32).at[0, :80].set(jnp.tile(b2, 4)),
        "wf1": wf1p.astype(compute_dtype),
        "bf1": jnp.zeros((1, 128), f32).at[0, :50].set(bf1),
        "wf2": wf2p.astype(compute_dtype),
        "bf2": jnp.zeros((1, 128), f32).at[0, :NUM_CLASSES].set(bf2),
    }


# ------------------------------- JAX wrapper -------------------------------- #

def net_forward(packed, x, *, batch_tile=8):
    """x: (B, 1, 28, 28) float32 -> (B, 10) log-probabilities."""
    B, C, H, W = x.shape
    if (C, H, W) != (1, 28, 28):
        raise ValueError("fused kernel is specialized to 1x28x28 MNIST inputs")
    tb = batch_tile
    if tb % 8 != 0:
        raise ValueError("batch_tile must be a multiple of 8")
    bp = pl.cdiv(B, tb) * tb

    # Split image rows by (row mod 4) so every in-kernel slice is unit-stride.
    x4 = x.reshape(B, 7, 4, 28).transpose(2, 1, 0, 3)          # (4, 7, B, 28)
    if bp != B:
        x4 = jnp.pad(x4, ((0, 0), (0, 0), (0, bp - B), (0, 0)))

    out = pl.pallas_call(
        fused_net_kernel,
        out_shape=jax.ShapeDtypeStruct((bp, 128), jnp.float32),
        grid=(bp // tb,),
        in_specs=[
            pl.BlockSpec((4, 7, tb, 28), lambda i: (0, 0, i, 0)),
            pl.BlockSpec((5, 28, 256), lambda i: (0, 0, 0)),
            pl.BlockSpec((1, 128), lambda i: (0, 0)),
            pl.BlockSpec((640, 256), lambda i: (0, 0)),
            pl.BlockSpec((1, 128), lambda i: (0, 0)),
            pl.BlockSpec((4 * 128, H1P), lambda i: (0, 0)),
            pl.BlockSpec((1, 128), lambda i: (0, 0)),
            pl.BlockSpec((H1P, 128), lambda i: (0, 0)),
            pl.BlockSpec((1, 128), lambda i: (0, 0)),
        ],
        out_specs=pl.BlockSpec((tb, 128), lambda i: (i, 0)),
        compiler_params=pltpu.CompilerParams(
            dimension_semantics=("parallel",)),    # shard batch tiles over TCs
    )(x4, packed["w1"], packed["b1"], packed["w2"], packed["b2"],
      packed["wf1"], packed["bf1"], packed["wf2"], packed["bf2"])
    return out[:B, :NUM_CLASSES]


# ----------------------------- pure-JAX reference --------------------------- #

def reference(params, x):
    def conv(y, w, b):
        y = jax.lax.conv_general_dilated(y, w, (1, 1), "VALID",
                                         dimension_numbers=("NCHW", "OIHW", "NCHW"))
        return y + b[None, :, None, None]

    y = conv(x, params["w_conv1"], params["b_conv1"])
    y = jax.lax.reduce_window(y, -jnp.inf, jax.lax.max, (1, 1, 2, 2), (1, 1, 2, 2), "VALID")
    y = jnp.maximum(y, 0.0)
    y = conv(y, params["w_conv2"], params["b_conv2"])
    y = jax.lax.reduce_window(y, -jnp.inf, jax.lax.max, (1, 1, 2, 2), (1, 1, 2, 2), "VALID")
    y = jnp.maximum(y, 0.0)
    y = y.reshape(y.shape[0], -1)
    y = jnp.maximum(y @ params["w_fc1"] + params["b_fc1"], 0.0)
    y = y @ params["w_fc2"] + params["b_fc2"]
    return jax.nn.log_softmax(y, axis=-1)


# ----------------------------------- main ----------------------------------- #

if __name__ == "__main__":
    key = jax.random.PRNGKey(0)
    ks = jax.random.split(key, 9)
    params = {
        "w_conv1": 0.10 * jax.random.normal(ks[0], (10, 1, 5, 5), jnp.float32),
        "b_conv1": 0.10 * jax.random.normal(ks[1], (10,), jnp.float32),
        "w_conv2": 0.05 * jax.random.normal(ks[2], (20, 10, 5, 5), jnp.float32),
        "b_conv2": 0.05 * jax.random.normal(ks[3], (20,), jnp.float32),
        # fc weights stored as (in, out) = PyTorch nn.Linear weight.T
        "w_fc1": 0.05 * jax.random.normal(ks[4], (320, 50), jnp.float32),
        "b_fc1": 0.05 * jax.random.normal(ks[5], (50,), jnp.float32),
        "w_fc2": 0.10 * jax.random.normal(ks[6], (50, 10), jnp.float32),
        "b_fc2": 0.10 * jax.random.normal(ks[7], (10,), jnp.float32),
    }
    x = jax.random.normal(ks[8], (2, 1, 28, 28), jnp.float32)

    ref = jax.block_until_ready(reference(params, x))

    # f32 MXU operands: bitwise-close to the f32 reference.
    packed_f32 = pack_params(params, jnp.float32)
    out = jax.block_until_ready(jax.jit(net_forward)(packed_f32, x))
    assert out.shape == (2, 10), out.shape
    np.testing.assert_allclose(np.asarray(out), np.asarray(ref), rtol=1e-4, atol=1e-4)

    # bf16 MXU operands (f32 accumulation): perf path for v5e/v6e/v7x.
    packed_bf16 = pack_params(params, jnp.bfloat16)
    out_bf16 = jax.block_until_ready(jax.jit(net_forward)(packed_bf16, x))
    np.testing.assert_allclose(np.asarray(out_bf16), np.asarray(ref), rtol=5e-2, atol=5e-2)

    print("KERNEL_OK")
</pallas_src>

<mosaic_0001>
module attributes {stable_mosaic.version = 11 : i64} {
  func.func @fused_net_kernel(%arg0: i32, %arg1: memref<4x7x8x28xf32, #tpu.memory_space<vmem>>, %arg2: memref<5x28x256xf32, #tpu.memory_space<vmem>>, %arg3: memref<1x128xf32, #tpu.memory_space<vmem>>, %arg4: memref<640x256xf32, #tpu.memory_space<vmem>>, %arg5: memref<1x128xf32, #tpu.memory_space<vmem>>, %arg6: memref<512x128xf32, #tpu.memory_space<vmem>>, %arg7: memref<1x128xf32, #tpu.memory_space<vmem>>, %arg8: memref<128x128xf32, #tpu.memory_space<vmem>>, %arg9: memref<1x128xf32, #tpu.memory_space<vmem>>, %arg10: memref<8x128xf32, #tpu.memory_space<vmem>>) attributes {dimension_semantics = [#tpu.dimension_semantics<parallel>], iteration_bounds = array<i64: 1>, scalar_prefetch = 0 : i64, scratch_operands = 0 : i64, tpu.core_type = #tpu.core_type<tc>, window_params = [{transform_indices = @transform_0, window_bounds = array<i64: 4, 7, 8, 28>}, {pipeline_mode = #tpu.pipeline_mode<synchronous>, transform_indices = @transform_1, window_bounds = array<i64: 5, 28, 256>}, {pipeline_mode = #tpu.pipeline_mode<synchronous>, transform_indices = @transform_2, window_bounds = array<i64: 1, 128>}, {pipeline_mode = #tpu.pipeline_mode<synchronous>, transform_indices = @transform_3, window_bounds = array<i64: 640, 256>}, {pipeline_mode = #tpu.pipeline_mode<synchronous>, transform_indices = @transform_4, window_bounds = array<i64: 1, 128>}, {pipeline_mode = #tpu.pipeline_mode<synchronous>, transform_indices = @transform_5, window_bounds = array<i64: 512, 128>}, {pipeline_mode = #tpu.pipeline_mode<synchronous>, transform_indices = @transform_6, window_bounds = array<i64: 1, 128>}, {pipeline_mode = #tpu.pipeline_mode<synchronous>, transform_indices = @transform_7, window_bounds = array<i64: 128, 128>}, {pipeline_mode = #tpu.pipeline_mode<synchronous>, transform_indices = @transform_8, window_bounds = array<i64: 1, 128>}, {transform_indices = @transform_9, window_bounds = array<i64: 8, 128>}]} {
    %c0 = arith.constant 0 : index
    %c0_0 = arith.constant 0 : index
    %c0_1 = arith.constant 0 : index
    %c0_2 = arith.constant 0 : index
    %0 = vector.load %arg1[%c0, %c0_0, %c0_1, %c0_2] : memref<4x7x8x28xf32, #tpu.memory_space<vmem>>, vector<4x7x8x28xf32>
    %1 = vector.extract_strided_slice %0 {offsets = [0, 0, 0, 0], sizes = [1, 6, 8, 28], strides = [1, 1, 1, 1]} : vector<4x7x8x28xf32> to vector<1x6x8x28xf32>
    %2 = vector.shape_cast %1 : vector<1x6x8x28xf32> to vector<6x8x28xf32>
    %3 = vector.extract_strided_slice %0 {offsets = [1, 0, 0, 0], sizes = [1, 6, 8, 28], strides = [1, 1, 1, 1]} : vector<4x7x8x28xf32> to vector<1x6x8x28xf32>
    %4 = vector.shape_cast %3 : vector<1x6x8x28xf32> to vector<6x8x28xf32>
    %5 = vector.extract_strided_slice %0 {offsets = [2, 0, 0, 0], sizes = [1, 6, 8, 28], strides = [1, 1, 1, 1]} : vector<4x7x8x28xf32> to vector<1x6x8x28xf32>
    %6 = vector.shape_cast %5 : vector<1x6x8x28xf32> to vector<6x8x28xf32>
    %7 = vector.extract_strided_slice %0 {offsets = [3, 0, 0, 0], sizes = [1, 6, 8, 28], strides = [1, 1, 1, 1]} : vector<4x7x8x28xf32> to vector<1x6x8x28xf32>
    %8 = vector.shape_cast %7 : vector<1x6x8x28xf32> to vector<6x8x28xf32>
    %9 = tpu.concatenate %2, %4, %6, %8 in 0 : vector<6x8x28xf32>, vector<6x8x28xf32>, vector<6x8x28xf32>, vector<6x8x28xf32> -> vector<24x8x28xf32>
    %10 = vector.shape_cast %9 : vector<24x8x28xf32> to vector<192x28xf32>
    %c0_3 = arith.constant 0 : index
    %c0_4 = arith.constant 0 : index
    %c0_5 = arith.constant 0 : index
    %11 = vector.load %arg2[%c0_3, %c0_4, %c0_5] : memref<5x28x256xf32, #tpu.memory_space<vmem>>, vector<1x28x256xf32>
    %12 = vector.shape_cast %11 : vector<1x28x256xf32> to vector<28x256xf32>
    %cst = arith.constant dense<0.000000e+00> : vector<192x256xf32>
    %13 = tpu.matmul %10, %12, %cst {dimension_numbers = #tpu.dot_dimension_numbers<[1], [0], [0], [1], [0, 0, 1, 1], [], []>} : vector<192x28xf32>, vector<28x256xf32>, vector<192x256xf32> -> vector<192x256xf32>
    %14 = vector.extract_strided_slice %0 {offsets = [1, 0, 0, 0], sizes = [1, 6, 8, 28], strides = [1, 1, 1, 1]} : vector<4x7x8x28xf32> to vector<1x6x8x28xf32>
    %15 = vector.shape_cast %14 : vector<1x6x8x28xf32> to vector<6x8x28xf32>
    %16 = vector.extract_strided_slice %0 {offsets = [2, 0, 0, 0], sizes = [1, 6, 8, 28], strides = [1, 1, 1, 1]} : vector<4x7x8x28xf32> to vector<1x6x8x28xf32>
    %17 = vector.shape_cast %16 : vector<1x6x8x28xf32> to vector<6x8x28xf32>
    %18 = vector.extract_strided_slice %0 {offsets = [3, 0, 0, 0], sizes = [1, 6, 8, 28], strides = [1, 1, 1, 1]} : vector<4x7x8x28xf32> to vector<1x6x8x28xf32>
    %19 = vector.shape_cast %18 : vector<1x6x8x28xf32> to vector<6x8x28xf32>
    %20 = vector.extract_strided_slice %0 {offsets = [0, 1, 0, 0], sizes = [1, 6, 8, 28], strides = [1, 1, 1, 1]} : vector<4x7x8x28xf32> to vector<1x6x8x28xf32>
    %21 = vector.shape_cast %20 : vector<1x6x8x28xf32> to vector<6x8x28xf32>
    %22 = tpu.concatenate %15, %17, %19, %21 in 0 : vector<6x8x28xf32>, vector<6x8x28xf32>, vector<6x8x28xf32>, vector<6x8x28xf32> -> vector<24x8x28xf32>
    %23 = vector.shape_cast %22 : vector<24x8x28xf32> to vector<192x28xf32>
    %c1 = arith.constant 1 : index
    %c0_6 = arith.constant 0 : index
    %c0_7 = arith.constant 0 : index
    %24 = vector.load %arg2[%c1, %c0_6, %c0_7] : memref<5x28x256xf32, #tpu.memory_space<vmem>>, vector<1x28x256xf32>
    %25 = vector.shape_cast %24 : vector<1x28x256xf32> to vector<28x256xf32>
    %cst_8 = arith.constant dense<0.000000e+00> : vector<192x256xf32>
    %26 = tpu.matmul %23, %25, %cst_8 {dimension_numbers = #tpu.dot_dimension_numbers<[1], [0], [0], [1], [0, 0, 1, 1], [], []>} : vector<192x28xf32>, vector<28x256xf32>, vector<192x256xf32> -> vector<192x256xf32>
    %27 = arith.addf %13, %26 : vector<192x256xf32>
    %28 = vector.extract_strided_slice %0 {offsets = [2, 0, 0, 0], sizes = [1, 6, 8, 28], strides = [1, 1, 1, 1]} : vector<4x7x8x28xf32> to vector<1x6x8x28xf32>
    %29 = vector.shape_cast %28 : vector<1x6x8x28xf32> to vector<6x8x28xf32>
    %30 = vector.extract_strided_slice %0 {offsets = [3, 0, 0, 0], sizes = [1, 6, 8, 28], strides = [1, 1, 1, 1]} : vector<4x7x8x28xf32> to vector<1x6x8x28xf32>
    %31 = vector.shape_cast %30 : vector<1x6x8x28xf32> to vector<6x8x28xf32>
    %32 = vector.extract_strided_slice %0 {offsets = [0, 1, 0, 0], sizes = [1, 6, 8, 28], strides = [1, 1, 1, 1]} : vector<4x7x8x28xf32> to vector<1x6x8x28xf32>
    %33 = vector.shape_cast %32 : vector<1x6x8x28xf32> to vector<6x8x28xf32>
    %34 = vector.extract_strided_slice %0 {offsets = [1, 1, 0, 0], sizes = [1, 6, 8, 28], strides = [1, 1, 1, 1]} : vector<4x7x8x28xf32> to vector<1x6x8x28xf32>
    %35 = vector.shape_cast %34 : vector<1x6x8x28xf32> to vector<6x8x28xf32>
    %36 = tpu.concatenate %29, %31, %33, %35 in 0 : vector<6x8x28xf32>, vector<6x8x28xf32>, vector<6x8x28xf32>, vector<6x8x28xf32> -> vector<24x8x28xf32>
    %37 = vector.shape_cast %36 : vector<24x8x28xf32> to vector<192x28xf32>
    %c2 = arith.constant 2 : index
    %c0_9 = arith.constant 0 : index
    %c0_10 = arith.constant 0 : index
    %38 = vector.load %arg2[%c2, %c0_9, %c0_10] : memref<5x28x256xf32, #tpu.memory_space<vmem>>, vector<1x28x256xf32>
    %39 = vector.shape_cast %38 : vector<1x28x256xf32> to vector<28x256xf32>
    %cst_11 = arith.constant dense<0.000000e+00> : vector<192x256xf32>
    %40 = tpu.matmul %37, %39, %cst_11 {dimension_numbers = #tpu.dot_dimension_numbers<[1], [0], [0], [1], [0, 0, 1, 1], [], []>} : vector<192x28xf32>, vector<28x256xf32>, vector<192x256xf32> -> vector<192x256xf32>
    %41 = arith.addf %27, %40 : vector<192x256xf32>
    %42 = vector.extract_strided_slice %0 {offsets = [3, 0, 0, 0], sizes = [1, 6, 8, 28], strides = [1, 1, 1, 1]} : vector<4x7x8x28xf32> to vector<1x6x8x28xf32>
    %43 = vector.shape_cast %42 : vector<1x6x8x28xf32> to vector<6x8x28xf32>
    %44 = vector.extract_strided_slice %0 {offsets = [0, 1, 0, 0], sizes = [1, 6, 8, 28], strides = [1, 1, 1, 1]} : vector<4x7x8x28xf32> to vector<1x6x8x28xf32>
    %45 = vector.shape_cast %44 : vector<1x6x8x28xf32> to vector<6x8x28xf32>
    %46 = vector.extract_strided_slice %0 {offsets = [1, 1, 0, 0], sizes = [1, 6, 8, 28], strides = [1, 1, 1, 1]} : vector<4x7x8x28xf32> to vector<1x6x8x28xf32>
    %47 = vector.shape_cast %46 : vector<1x6x8x28xf32> to vector<6x8x28xf32>
    %48 = vector.extract_strided_slice %0 {offsets = [2, 1, 0, 0], sizes = [1, 6, 8, 28], strides = [1, 1, 1, 1]} : vector<4x7x8x28xf32> to vector<1x6x8x28xf32>
    %49 = vector.shape_cast %48 : vector<1x6x8x28xf32> to vector<6x8x28xf32>
    %50 = tpu.concatenate %43, %45, %47, %49 in 0 : vector<6x8x28xf32>, vector<6x8x28xf32>, vector<6x8x28xf32>, vector<6x8x28xf32> -> vector<24x8x28xf32>
    %51 = vector.shape_cast %50 : vector<24x8x28xf32> to vector<192x28xf32>
    %c3 = arith.constant 3 : index
    %c0_12 = arith.constant 0 : index
    %c0_13 = arith.constant 0 : index
    %52 = vector.load %arg2[%c3, %c0_12, %c0_13] : memref<5x28x256xf32, #tpu.memory_space<vmem>>, vector<1x28x256xf32>
    %53 = vector.shape_cast %52 : vector<1x28x256xf32> to vector<28x256xf32>
    %cst_14 = arith.constant dense<0.000000e+00> : vector<192x256xf32>
    %54 = tpu.matmul %51, %53, %cst_14 {dimension_numbers = #tpu.dot_dimension_numbers<[1], [0], [0], [1], [0, 0, 1, 1], [], []>} : vector<192x28xf32>, vector<28x256xf32>, vector<192x256xf32> -> vector<192x256xf32>
    %55 = arith.addf %41, %54 : vector<192x256xf32>
    %56 = vector.extract_strided_slice %0 {offsets = [0, 1, 0, 0], sizes = [1, 6, 8, 28], strides = [1, 1, 1, 1]} : vector<4x7x8x28xf32> to vector<1x6x8x28xf32>
    %57 = vector.shape_cast %56 : vector<1x6x8x28xf32> to vector<6x8x28xf32>
    %58 = vector.extract_strided_slice %0 {offsets = [1, 1, 0, 0], sizes = [1, 6, 8, 28], strides = [1, 1, 1, 1]} : vector<4x7x8x28xf32> to vector<1x6x8x28xf32>
    %59 = vector.shape_cast %58 : vector<1x6x8x28xf32> to vector<6x8x28xf32>
    %60 = vector.extract_strided_slice %0 {offsets = [2, 1, 0, 0], sizes = [1, 6, 8, 28], strides = [1, 1, 1, 1]} : vector<4x7x8x28xf32> to vector<1x6x8x28xf32>
    %61 = vector.shape_cast %60 : vector<1x6x8x28xf32> to vector<6x8x28xf32>
    %62 = vector.extract_strided_slice %0 {offsets = [3, 1, 0, 0], sizes = [1, 6, 8, 28], strides = [1, 1, 1, 1]} : vector<4x7x8x28xf32> to vector<1x6x8x28xf32>
    %63 = vector.shape_cast %62 : vector<1x6x8x28xf32> to vector<6x8x28xf32>
    %64 = tpu.concatenate %57, %59, %61, %63 in 0 : vector<6x8x28xf32>, vector<6x8x28xf32>, vector<6x8x28xf32>, vector<6x8x28xf32> -> vector<24x8x28xf32>
    %65 = vector.shape_cast %64 : vector<24x8x28xf32> to vector<192x28xf32>
    %c4 = arith.constant 4 : index
    %c0_15 = arith.constant 0 : index
    %c0_16 = arith.constant 0 : index
    %66 = vector.load %arg2[%c4, %c0_15, %c0_16] : memref<5x28x256xf32, #tpu.memory_space<vmem>>, vector<1x28x256xf32>
    %67 = vector.shape_cast %66 : vector<1x28x256xf32> to vector<28x256xf32>
    %cst_17 = arith.constant dense<0.000000e+00> : vector<192x256xf32>
    %68 = tpu.matmul %65, %67, %cst_17 {dimension_numbers = #tpu.dot_dimension_numbers<[1], [0], [0], [1], [0, 0, 1, 1], [], []>} : vector<192x28xf32>, vector<28x256xf32>, vector<192x256xf32> -> vector<192x256xf32>
    %69 = arith.addf %55, %68 : vector<192x256xf32>
    %70 = vector.extract_strided_slice %69 {offsets = [0, 0], sizes = [48, 256], strides = [1, 1]} : vector<192x256xf32> to vector<48x256xf32>
    %71 = vector.extract_strided_slice %70 {offsets = [0, 0], sizes = [48, 128], strides = [1, 1]} : vector<48x256xf32> to vector<48x128xf32>
    %72 = vector.extract_strided_slice %70 {offsets = [0, 128], sizes = [48, 128], strides = [1, 1]} : vector<48x256xf32> to vector<48x128xf32>
    %73 = arith.maximumf %71, %72 : vector<48x128xf32>
    %74 = vector.extract_strided_slice %69 {offsets = [48, 0], sizes = [48, 256], strides = [1, 1]} : vector<192x256xf32> to vector<48x256xf32>
    %75 = vector.extract_strided_slice %74 {offsets = [0, 0], sizes = [48, 128], strides = [1, 1]} : vector<48x256xf32> to vector<48x128xf32>
    %76 = vector.extract_strided_slice %74 {offsets = [0, 128], sizes = [48, 128], strides = [1, 1]} : vector<48x256xf32> to vector<48x128xf32>
    %77 = arith.maximumf %75, %76 : vector<48x128xf32>
    %78 = arith.maximumf %73, %77 : vector<48x128xf32>
    %c0_18 = arith.constant 0 : index
    %c0_19 = arith.constant 0 : index
    %79 = vector.load %arg3[%c0_18, %c0_19] : memref<1x128xf32, #tpu.memory_space<vmem>>, vector<1x128xf32>
    %80 = vector.broadcast %79 : vector<1x128xf32> to vector<48x128xf32>
    %81 = arith.addf %78, %80 : vector<48x128xf32>
    %cst_20 = arith.constant 0.000000e+00 : f32
    %82 = vector.broadcast %cst_20 : f32 to vector<48x128xf32>
    %83 = arith.maximumf %81, %82 : vector<48x128xf32>
    %84 = vector.extract_strided_slice %69 {offsets = [96, 0], sizes = [48, 256], strides = [1, 1]} : vector<192x256xf32> to vector<48x256xf32>
    %85 = vector.extract_strided_slice %84 {offsets = [0, 0], sizes = [48, 128], strides = [1, 1]} : vector<48x256xf32> to vector<48x128xf32>
    %86 = vector.extract_strided_slice %84 {offsets = [0, 128], sizes = [48, 128], strides = [1, 1]} : vector<48x256xf32> to vector<48x128xf32>
    %87 = arith.maximumf %85, %86 : vector<48x128xf32>
    %88 = vector.extract_strided_slice %69 {offsets = [144, 0], sizes = [48, 256], strides = [1, 1]} : vector<192x256xf32> to vector<48x256xf32>
    %89 = vector.extract_strided_slice %88 {offsets = [0, 0], sizes = [48, 128], strides = [1, 1]} : vector<48x256xf32> to vector<48x128xf32>
    %90 = vector.extract_strided_slice %88 {offsets = [0, 128], sizes = [48, 128], strides = [1, 1]} : vector<48x256xf32> to vector<48x128xf32>
    %91 = arith.maximumf %89, %90 : vector<48x128xf32>
    %92 = arith.maximumf %87, %91 : vector<48x128xf32>
    %c0_21 = arith.constant 0 : index
    %c0_22 = arith.constant 0 : index
    %93 = vector.load %arg3[%c0_21, %c0_22] : memref<1x128xf32, #tpu.memory_space<vmem>>, vector<1x128xf32>
    %94 = vector.broadcast %93 : vector<1x128xf32> to vector<48x128xf32>
    %95 = arith.addf %92, %94 : vector<48x128xf32>
    %cst_23 = arith.constant 0.000000e+00 : f32
    %96 = vector.broadcast %cst_23 : f32 to vector<48x128xf32>
    %97 = arith.maximumf %95, %96 : vector<48x128xf32>
    %98 = vector.extract_strided_slice %83 {offsets = [0, 0], sizes = [32, 128], strides = [1, 1]} : vector<48x128xf32> to vector<32x128xf32>
    %99 = vector.extract_strided_slice %97 {offsets = [0, 0], sizes = [32, 128], strides = [1, 1]} : vector<48x128xf32> to vector<32x128xf32>
    %100 = vector.extract_strided_slice %83 {offsets = [8, 0], sizes = [32, 128], strides = [1, 1]} : vector<48x128xf32> to vector<32x128xf32>
    %101 = vector.extract_strided_slice %97 {offsets = [8, 0], sizes = [32, 128], strides = [1, 1]} : vector<48x128xf32> to vector<32x128xf32>
    %102 = vector.extract_strided_slice %83 {offsets = [16, 0], sizes = [32, 128], strides = [1, 1]} : vector<48x128xf32> to vector<32x128xf32>
    %103 = tpu.concatenate %98, %99, %100, %101, %102 in 1 : vector<32x128xf32>, vector<32x128xf32>, vector<32x128xf32>, vector<32x128xf32>, vector<32x128xf32> -> vector<32x640xf32>
    %104 = vector.extract_strided_slice %97 {offsets = [0, 0], sizes = [32, 128], strides = [1, 1]} : vector<48x128xf32> to vector<32x128xf32>
    %105 = vector.extract_strided_slice %83 {offsets = [8, 0], sizes = [32, 128], strides = [1, 1]} : vector<48x128xf32> to vector<32x128xf32>
    %106 = vector.extract_strided_slice %97 {offsets = [8, 0], sizes = [32, 128], strides = [1, 1]} : vector<48x128xf32> to vector<32x128xf32>
    %107 = vector.extract_strided_slice %83 {offsets = [16, 0], sizes = [32, 128], strides = [1, 1]} : vector<48x128xf32> to vector<32x128xf32>
    %108 = vector.extract_strided_slice %97 {offsets = [16, 0], sizes = [32, 128], strides = [1, 1]} : vector<48x128xf32> to vector<32x128xf32>
    %109 = tpu.concatenate %104, %105, %106, %107, %108 in 1 : vector<32x128xf32>, vector<32x128xf32>, vector<32x128xf32>, vector<32x128xf32>, vector<32x128xf32> -> vector<32x640xf32>
    %110 = tpu.concatenate %103, %109 in 0 : vector<32x640xf32>, vector<32x640xf32> -> vector<64x640xf32>
    %c0_24 = arith.constant 0 : index
    %c0_25 = arith.constant 0 : index
    %111 = vector.load %arg4[%c0_24, %c0_25] : memref<640x256xf32, #tpu.memory_space<vmem>>, vector<640x256xf32>
    %cst_26 = arith.constant dense<0.000000e+00> : vector<64x256xf32>
    %112 = tpu.matmul %110, %111, %cst_26 {dimension_numbers = #tpu.dot_dimension_numbers<[1], [0], [0], [1], [0, 0, 1, 1], [], []>} : vector<64x640xf32>, vector<640x256xf32>, vector<64x256xf32> -> vector<64x256xf32>
    %113 = vector.extract_strided_slice %112 {offsets = [0, 0], sizes = [32, 128], strides = [1, 1]} : vector<64x256xf32> to vector<32x128xf32>
    %114 = vector.extract_strided_slice %112 {offsets = [0, 128], sizes = [32, 128], strides = [1, 1]} : vector<64x256xf32> to vector<32x128xf32>
    %115 = arith.maximumf %113, %114 : vector<32x128xf32>
    %116 = vector.extract_strided_slice %112 {offsets = [32, 0], sizes = [32, 128], strides = [1, 1]} : vector<64x256xf32> to vector<32x128xf32>
    %117 = vector.extract_strided_slice %112 {offsets = [32, 128], sizes = [32, 128], strides = [1, 1]} : vector<64x256xf32> to vector<32x128xf32>
    %118 = arith.maximumf %116, %117 : vector<32x128xf32>
    %119 = arith.maximumf %115, %118 : vector<32x128xf32>
    %c0_27 = arith.constant 0 : index
    %c0_28 = arith.constant 0 : index
    %120 = vector.load %arg5[%c0_27, %c0_28] : memref<1x128xf32, #tpu.memory_space<vmem>>, vector<1x128xf32>
    %121 = vector.broadcast %120 : vector<1x128xf32> to vector<32x128xf32>
    %122 = arith.addf %119, %121 : vector<32x128xf32>
    %cst_29 = arith.constant 0.000000e+00 : f32
    %123 = vector.broadcast %cst_29 : f32 to vector<32x128xf32>
    %124 = arith.maximumf %122, %123 : vector<32x128xf32>
    %125 = vector.extract_strided_slice %124 {offsets = [0, 0], sizes = [8, 128], strides = [1, 1]} : vector<32x128xf32> to vector<8x128xf32>
    %126 = vector.extract_strided_slice %124 {offsets = [8, 0], sizes = [8, 128], strides = [1, 1]} : vector<32x128xf32> to vector<8x128xf32>
    %127 = vector.extract_strided_slice %124 {offsets = [16, 0], sizes = [8, 128], strides = [1, 1]} : vector<32x128xf32> to vector<8x128xf32>
    %128 = vector.extract_strided_slice %124 {offsets = [24, 0], sizes = [8, 128], strides = [1, 1]} : vector<32x128xf32> to vector<8x128xf32>
    %129 = tpu.concatenate %125, %126, %127, %128 in 1 : vector<8x128xf32>, vector<8x128xf32>, vector<8x128xf32>, vector<8x128xf32> -> vector<8x512xf32>
    %c0_30 = arith.constant 0 : index
    %c0_31 = arith.constant 0 : index
    %130 = vector.load %arg6[%c0_30, %c0_31] : memref<512x128xf32, #tpu.memory_space<vmem>>, vector<512x128xf32>
    %cst_32 = arith.constant dense<0.000000e+00> : vector<8x128xf32>
    %131 = tpu.matmul %129, %130, %cst_32 {dimension_numbers = #tpu.dot_dimension_numbers<[1], [0], [0], [1], [0, 0, 1, 1], [], []>} : vector<8x512xf32>, vector<512x128xf32>, vector<8x128xf32> -> vector<8x128xf32>
    %c0_33 = arith.constant 0 : index
    %c0_34 = arith.constant 0 : index
    %132 = vector.load %arg7[%c0_33, %c0_34] : memref<1x128xf32, #tpu.memory_space<vmem>>, vector<1x128xf32>
    %133 = vector.broadcast %132 : vector<1x128xf32> to vector<8x128xf32>
    %134 = arith.addf %131, %133 : vector<8x128xf32>
    %cst_35 = arith.constant 0.000000e+00 : f32
    %135 = vector.broadcast %cst_35 : f32 to vector<8x128xf32>
    %136 = arith.maximumf %134, %135 : vector<8x128xf32>
    %c0_36 = arith.constant 0 : index
    %c0_37 = arith.constant 0 : index
    %137 = vector.load %arg8[%c0_36, %c0_37] : memref<128x128xf32, #tpu.memory_space<vmem>>, vector<128x128xf32>
    %cst_38 = arith.constant dense<0.000000e+00> : vector<8x128xf32>
    %138 = tpu.matmul %136, %137, %cst_38 {dimension_numbers = #tpu.dot_dimension_numbers<[1], [0], [0], [1], [0, 0, 1, 1], [], []>} : vector<8x128xf32>, vector<128x128xf32>, vector<8x128xf32> -> vector<8x128xf32>
    %c0_39 = arith.constant 0 : index
    %c0_40 = arith.constant 0 : index
    %139 = vector.load %arg9[%c0_39, %c0_40] : memref<1x128xf32, #tpu.memory_space<vmem>>, vector<1x128xf32>
    %140 = vector.broadcast %139 : vector<1x128xf32> to vector<8x128xf32>
    %141 = arith.addf %138, %140 : vector<8x128xf32>
    %142 = tpu.iota {dimensions = array<i32: 1>} : vector<8x128xi32>
    %c10_i32 = arith.constant 10 : i32
    %143 = vector.broadcast %c10_i32 : i32 to vector<8x128xi32>
    %144 = arith.cmpi slt, %142, %143 : vector<8x128xi32>
    %cst_41 = arith.constant -1.000000e+30 : f32
    %145 = vector.broadcast %cst_41 : f32 to vector<8x128xf32>
    %146 = arith.select %144, %141, %145 : vector<8x128xi1>, vector<8x128xf32>
    %cst_42 = arith.constant dense<0xFF800000> : vector<8xf32>
    %147 = vector.multi_reduction <maximumf>, %146, %cst_42 [1] : vector<8x128xf32> to vector<8xf32>
    %148 = vector.shape_cast %147 : vector<8xf32> to vector<8x1xf32>
    %149 = vector.broadcast %148 : vector<8x1xf32> to vector<8x128xf32>
    %150 = arith.subf %146, %149 : vector<8x128xf32>
    %151 = math.exp %150 : vector<8x128xf32>
    %cst_43 = arith.constant dense<0.000000e+00> : vector<8xf32>
    %152 = vector.multi_reduction <add>, %151, %cst_43 [1] : vector<8x128xf32> to vector<8xf32>
    %153 = vector.shape_cast %152 : vector<8xf32> to vector<8x1xf32>
    %154 = math.log %153 : vector<8x1xf32>
    %155 = vector.broadcast %154 : vector<8x1xf32> to vector<8x128xf32>
    %156 = arith.subf %150, %155 : vector<8x128xf32>
    %c0_44 = arith.constant 0 : index
    %c0_45 = arith.constant 0 : index
    %157 = vector.load %arg10[%c0_44, %c0_45] : memref<8x128xf32, #tpu.memory_space<vmem>>, vector<8x128xf32>
    tpu.vector_store %arg10[%c0_44, %c0_45], %156 {strides = array<i32>} : memref<8x128xf32, #tpu.memory_space<vmem>>, vector<8x128xf32>,
    return
  }
  func.func @transform_0(%arg0: i32) -> (i32, i32, i32, i32) {
    %c0_i32 = arith.constant 0 : i32
    %c0_i32_0 = arith.constant 0 : i32
    %c0_i32_1 = arith.constant 0 : i32
    %c0_i32_2 = arith.constant 0 : i32
    return %c0_i32, %c0_i32_0, %arg0, %c0_i32_1 : i32, i32, i32, i32
  }
  func.func @transform_1(%arg0: i32) -> (i32, i32, i32) {
    %c0_i32 = arith.constant 0 : i32
    %c0_i32_0 = arith.constant 0 : i32
    %c0_i32_1 = arith.constant 0 : i32
    %c0_i32_2 = arith.constant 0 : i32
    return %c0_i32, %c0_i32_0, %c0_i32_1 : i32, i32, i32
  }
  func.func @transform_2(%arg0: i32) -> (i32, i32) {
    %c0_i32 = arith.constant 0 : i32
    %c0_i32_0 = arith.constant 0 : i32
    %c0_i32_1 = arith.constant 0 : i32
    return %c0_i32, %c0_i32_0 : i32, i32
  }
  func.func @transform_3(%arg0: i32) -> (i32, i32) {
    %c0_i32 = arith.constant 0 : i32
    %c0_i32_0 = arith.constant 0 : i32
    %c0_i32_1 = arith.constant 0 : i32
    return %c0_i32, %c0_i32_0 : i32, i32
  }
  func.func @transform_4(%arg0: i32) -> (i32, i32) {
    %c0_i32 = arith.constant 0 : i32
    %c0_i32_0 = arith.constant 0 : i32
    %c0_i32_1 = arith.constant 0 : i32
    return %c0_i32, %c0_i32_0 : i32, i32
  }
  func.func @transform_5(%arg0: i32) -> (i32, i32) {
    %c0_i32 = arith.constant 0 : i32
    %c0_i32_0 = arith.constant 0 : i32
    %c0_i32_1 = arith.constant 0 : i32
    return %c0_i32, %c0_i32_0 : i32, i32
  }
  func.func @transform_6(%arg0: i32) -> (i32, i32) {
    %c0_i32 = arith.constant 0 : i32
    %c0_i32_0 = arith.constant 0 : i32
    %c0_i32_1 = arith.constant 0 : i32
    return %c0_i32, %c0_i32_0 : i32, i32
  }
  func.func @transform_7(%arg0: i32) -> (i32, i32) {
    %c0_i32 = arith.constant 0 : i32
    %c0_i32_0 = arith.constant 0 : i32
    %c0_i32_1 = arith.constant 0 : i32
    return %c0_i32, %c0_i32_0 : i32, i32
  }
  func.func @transform_8(%arg0: i32) -> (i32, i32) {
    %c0_i32 = arith.constant 0 : i32
    %c0_i32_0 = arith.constant 0 : i32
    %c0_i32_1 = arith.constant 0 : i32
    return %c0_i32, %c0_i32_0 : i32, i32
  }
  func.func @transform_9(%arg0: i32) -> (i32, i32) {
    %c0_i32 = arith.constant 0 : i32
    %c0_i32_0 = arith.constant 0 : i32
    return %arg0, %c0_i32 : i32, i32
  }
}

</mosaic_0001>

<bundles_post_ra>
// kernel: net_forward.1
= control target key start
LH: loop header
LB: loop body
LE: loop exit
PB: predicated region body
PF: predicated region fallthrough
CT: control target
= control target key end

     0   :  { %14 = vsyncpa [#allocation3], 0  ;;  %s4310_s0 = inlined_call_operand.vmem [shape: f32[4,7,8,28], index: 0, kind: input, shape index: {}]   ;;  %s4311_s1 = inlined_call_operand.vmem [shape: f32[5,28,256], index: 1, kind: input, shape index: {}]   ;;  %s4312_s2 = inlined_call_operand.vmem [shape: f32[1,128], index: 2, kind: input, shape index: {}]   ;;  %s4313_s3 = inlined_call_operand.hbm [shape: f32[640,256], index: 3, kind: input, shape index: {}]   ;;  %s4314_s4 = inlined_call_operand.vmem [shape: f32[1,128], index: 4, kind: input, shape index: {}]   ;;  %s4315_s5 = inlined_call_operand.hbm [shape: f32[512,128], index: 5, kind: input, shape index: {}]   ;;  %s4316_s6 = inlined_call_operand.vmem [shape: f32[1,128], index: 6, kind: input, shape index: {}]   ;;  %s4317_s7 = inlined_call_operand.hbm [shape: f32[128,128], index: 7, kind: input, shape index: {}]   ;;  %s4318_s8 = inlined_call_operand.vmem [shape: f32[1,128], index: 8, kind: input, shape index: {}]   ;;  %s4319_s9 = inlined_call_operand.vmem [shape: f32[8,128], index: 9, kind: output, shape index: {}]  }
   0x1   :  { %15 = vsyncpa [#allocation5], 0  ;;  %s3268_s30 = smov [#allocation4]   ;;  %s3198_s13 = scalar_lea.hbm %s4315_s5, 8192 }
   0x2   :  { %s41_s10 = sshll.u32 %s3268_s30, 4  ;;  %p3199_p0 = scmp.ne.s32.totalorder %s4315_s5, %s3198_s13  ;;  %s42_s10 = int_to_ptr.vmem [resolvable:$true] %s41_s10 }
   0x3   :  { %p3202_p1 = scmp.lt.u32.totalorder %s3198_s13, %s4315_s5 }
   0x5   :  { %p3204_p2 = pnand %p3202_p1, %p3199_p0 }
   0x7   :  { %3207 = shalt.err (!%p3204_p2)
}
   0x8   :  { %s3208_s18 = scalar_lea.vmem %s42_s10, 8192  ;;  %p3213_p4 = scmp.lt.s32.totalorder %s42_s10, %s42_s10 }
   0x9   :  { %p3209_p3 = scmp.ne.s32.totalorder %s42_s10, %s3208_s18  ;;  %p3214_p5 = scmp.lt.s32.totalorder %s3208_s18, %s3208_s18 }
   0xb   :  { %p3215_p6 = por %p3214_p5, %p3213_p4 }
   0xd   :  { %p3216_p7 = pnand %p3215_p6, %p3209_p3 }
   0xf   :  { %3219 = shalt.err (!%p3216_p7)
}
  0x10   :  { %s3269_s19 = smov 128   ;;  %s3270_s20 = smov 8  }
  0x11   :  { %47 = dma.hbm_to_vmem [thread:$0]  %s4315_s5, 8192, %s42_s10, [#allocation5], %s3269_s19, %s3269_s19, %s3270_s20  }
  0x12   :  { %s3271_s23 = smov [#allocation2]   ;;  %s3220_s27 = scalar_lea.hbm %s4313_s3, 20480 }
  0x13   :  { %s27_s24 = sshll.u32 %s3271_s23, 4  ;;  %p3221_p8 = scmp.ne.s32.totalorder %s4313_s3, %s3220_s27  ;;  %s28_s24 = int_to_ptr.vmem [resolvable:$true] %s27_s24 }
  0x14   :  { %p3224_p9 = scmp.lt.u32.totalorder %s3220_s27, %s4313_s3 }
  0x16   :  { %p3226_p10 = pnand %p3224_p9, %p3221_p8 }
  0x18   :  { %3229 = shalt.err (!%p3226_p10)
}
  0x19   :  { %s3230_s12 = scalar_lea.vmem %s28_s24, 20480  ;;  %p3235_p12 = scmp.lt.s32.totalorder %s28_s24, %s28_s24 }
  0x1a   :  { %p3231_p11 = scmp.ne.s32.totalorder %s28_s24, %s3230_s12  ;;  %p3236_p13 = scmp.lt.s32.totalorder %s3230_s12, %s3230_s12 }
  0x1c   :  { %p3237_p0 = por %p3236_p13, %p3235_p12 }
  0x1e   :  { %p3238_p1 = pnand %p3237_p0, %p3231_p11 }
  0x20   :  { %3241 = shalt.err (!%p3238_p1)
}
  0x21   :  { %s3272_s5 = smov 256   ;;  %s3273_s10 = smov 16  }
  0x22   :  { %33 = dma.hbm_to_vmem [thread:$0]  %s4313_s3, 20480, %s28_s24, [#allocation3], %s3272_s5, %s3272_s5, %s3273_s10  }
  0x23   :  { %s3274_s15 = smov [#allocation6]   ;;  %s3242_s21 = scalar_lea.hbm %s4317_s7, 2048 }
  0x24   :  { %s55_s16 = sshll.u32 %s3274_s15, 4  ;;  %p3243_p2 = scmp.ne.s32.totalorder %s4317_s7, %s3242_s21  ;;  %s56_s16 = int_to_ptr.vmem [resolvable:$true] %s55_s16 }
  0x25   :  { %p3246_p3 = scmp.lt.u32.totalorder %s3242_s21, %s4317_s7 }
  0x27   :  { %p3248_p4 = pnand %p3246_p3, %p3243_p2 }
  0x29   :  { %3251 = shalt.err (!%p3248_p4)
}
  0x2a   :  { %s3252_s27 = scalar_lea.vmem %s56_s16, 2048  ;;  %p3257_p6 = scmp.lt.s32.totalorder %s56_s16, %s56_s16 }
  0x2b   :  { %p3253_p5 = scmp.ne.s32.totalorder %s56_s16, %s3252_s27  ;;  %p3258_p7 = scmp.lt.s32.totalorder %s3252_s27, %s3252_s27 }
  0x2d   :  { %p3259_p8 = por %p3258_p7, %p3257_p6 }
  0x2f   :  { %p3260_p9 = pnand %p3259_p8, %p3253_p5 }
  0x31   :  { %3263 = shalt.err (!%p3260_p9)
}
  0x32   :  { %61 = dma.hbm_to_vmem [thread:$0]  %s4317_s7, 2048, %s56_s16, [#allocation5], %s3269_s19, %s3269_s19, %s3270_s20  }
  0x33   :  { %3264 = dma.done.wait [#allocation3], 20480  }
  0x34   :  { %3265 = vsyncadd [#allocation3], 4294946816 }
  0x35   :  { %3266 = dma.done.wait [#allocation5], 10240  }
  0x36   :  { %3267 = vsyncadd [#allocation5], 4294957056  ;;  %v4320_v0 = vmov 0.0   ;;  %vm191_vm0 = vcmask 1043456   ;;  %v102_v1 = vld [vmem:[%s4311_s1 + $0x8] sm:$0xff]  ;;  %v104_v2 = vld [vmem:[%s4311_s1 + $0x18] sm:$0xff] }
  0x37   :  { %480 = vmatprep.mubr.f32.mxu0 %v4320_v0  ;;  %262 = vmatprep.mubr.f32.mxu1 %v4320_v0  ;;  %v101_v3 = vld [vmem:[%s4311_s1] sm:$0xff]  ;;  %v3382_v4 = vpack.c.bf16 %v104_v2, %v102_v1  ;;  %v103_v5 = vld [vmem:[%s4311_s1 + $0x10] sm:$0xff]  ;;  %v106_v6 = vld [vmem:[%s4311_s1 + $0x28] sm:$0xff]  ;;  %vm3276_vm1 = vmmov 1   ;;  %vm118_vm3 = vcmask 228352   ;;  %vm3278_vm4 = vmmov 0  }
  0x38   :  { %v108_v7 = vld [vmem:[%s4311_s1 + $0x38] sm:$0xf]  ;;  %v3393_v8 = vpack.c.bf16 %v103_v5, %v101_v3  ;;  %vm3395_vm2 = vmpackc.low %vm191_vm0, %vm3276_vm1  ;;  %v105_v11 = vld [vmem:[%s4311_s1 + $0x20] sm:$0xff] }
  0x39   :  { %v3399_v10 = vpack.c.bf16 %v108_v7, %v106_v6  ;;  %v107_v12 = vld [vmem:[%s4311_s1 + $0x30] sm:$0xf]  ;;  %2668 = vmatprep.subr.bf16.mxu0 %v3382_v4  ;;  %v2430_v13 = vld [vmem:[%s4311_s1 + $0x88] sm:$0xff]  ;;  %v2432_v14 = vld [vmem:[%s4311_s1 + $0x98] sm:$0xff] }
  0x3a   :  { %2670 = vmatpush1.bf16.msra.mxu0 %v3393_v8  ;;  %v3415_v15 = vpack.c.bf16 %v107_v12, %v105_v11  ;;  %v2677_v16 = vpack.c.bf16 %v2432_v14, %v2430_v13  ;;  %v2429_v17 = vld [vmem:[%s4311_s1 + $0x80] sm:$0xff]  ;;  %v2431_v18 = vld [vmem:[%s4311_s1 + $0x90] sm:$0xff]  ;;  %v2434_v19 = vld [vmem:[%s4311_s1 + $0xa8] sm:$0xff] }
  0x3b   :  { %2673 = vmatprep.subr.msk.bf16.mxu0 %vm3395_vm2, %v3399_v10  ;;  %v2436_v20 = vld [vmem:[%s4311_s1 + $0xb8] sm:$0xf]  ;;  %v73_v21 = vld [vmem:[%s4310_s0] sm:$0xff]  ;;  %v2435_v23 = vld [vmem:[%s4311_s1 + $0xb0] sm:$0xf]  ;;  %v2679_v24 = vpack.c.bf16 %v2431_v18, %v2429_v17 }
  0x3c   :  { %v2433_v22 = vld [vmem:[%s4311_s1 + $0xa0] sm:$0xff]  ;;  %v2464_v25 = vld [vmem:[%s4311_s1 + $0xc8] sm:$0xff]  ;;  %v2372_v27 = vld [vmem:[%s4311_s1 + $0x58] sm:$0xff]  ;;  %v2681_v28 = vpack.c.bf16 %v2436_v20, %v2434_v19 }
  0x3d   :  { %v2370_v26 = vld [vmem:[%s4311_s1 + $0x48] sm:$0xff]  ;;  %v2369_v30 = vld [vmem:[%s4311_s1 + $0x40] sm:$0xff]  ;;  %v2371_v31 = vld [vmem:[%s4311_s1 + $0x50] sm:$0xff]  ;;  %v2684_v40 = vpack.c.bf16 %v2435_v23, %v2433_v22 }
  0x3e   :  { %2676 = vmatpush1.bf16.msk.msra.mxu0 %vm3395_vm2, %v3415_v15  ;;  %v2657_v29 = vpack.c.bf16 %v2372_v27, %v2370_v26  ;;  %v2374_v32 = vld [vmem:[%s4311_s1 + $0x68] sm:$0xff]  ;;  %v2466_v33 = vld [vmem:[%s4311_s1 + $0xd8] sm:$0xff]  ;;  %v2659_v34 = vpack.c.bf16 %v2371_v31, %v2369_v30  ;;  %v2373_v36 = vld [vmem:[%s4311_s1 + $0x60] sm:$0xff] }
  0x3f   :  { %2678 = vmatprep.subr.bf16.mxu0 %v2677_v16  ;;  %v2376_v35 = vld [vmem:[%s4311_s1 + $0x78] sm:$0xf]  ;;  %v2375_v38 = vld [vmem:[%s4311_s1 + $0x70] sm:$0xf]  ;;  %v3479_v39 = vld [vmem:[%s4310_s0 + $0x8] sm:$0xff]  ;;  %v2687_v41 = vpack.c.bf16 %v2466_v33, %v2464_v25 }
  0x40   :  { %2658 = vmatprep.subr.bf16.mxu1 %v2657_v29  ;;  %v2661_v37 = vpack.c.bf16 %v2376_v35, %v2374_v32  ;;  %v2463_v42 = vld [vmem:[%s4311_s1 + $0xc0] sm:$0xff]  ;;  %v2465_v43 = vld [vmem:[%s4311_s1 + $0xd0] sm:$0xff]  ;;  %v2664_v44 = vpack.c.bf16 %v2375_v38, %v2373_v36  ;;  %v2468_v47 = vld [vmem:[%s4311_s1 + $0xe8] sm:$0xff] }
  0x41   :  { %2405 = vmatmul.mubr.msk.f32.vlgmr.msra.gmra.mrb[0].mxu0 %vm118_vm3, %v73_v21  ;;  %2660 = vmatpush1.bf16.msra.mxu1 %v2659_v34  ;;  %v3499_v45 = vld [vmem:[%s4310_s0 + $0x70] sm:$0xff]  ;;  %v2689_v46 = vpack.c.bf16 %v2465_v43, %v2463_v42  ;;  %v2470_v48 = vld [vmem:[%s4311_s1 + $0xf8] sm:$0xf]  ;;  %v2467_v50 = vld [vmem:[%s4311_s1 + $0xe0] sm:$0xff] }
  0x42   :  { %2680 = vmatpush1.bf16.msra.mxu0 %v2679_v24  ;;  %486 = vmatprep.mubr.f32.mxu0 %v4320_v0  ;;  %v2691_v49 = vpack.c.bf16 %v2470_v48, %v2468_v47  ;;  %v2469_v51 = vld [vmem:[%s4311_s1 + $0xf0] sm:$0xf]  ;;  %v3518_v52 = vld [vmem:[%s4310_s0 + $0x38] sm:$0xff]  ;;  %v2498_v53 = vld [vmem:[%s4311_s1 + $0x108] sm:$0xff] }
  0x43   :  { %2683 = vmatprep.subr.msk.bf16.mxu0 %vm3395_vm2, %v2681_v28  ;;  %2663 = vmatprep.subr.msk.bf16.mxu1 %vm3395_vm2, %v2661_v37  ;;  %v2500_v54 = vld [vmem:[%s4311_s1 + $0x118] sm:$0xff]  ;;  %v2694_v56 = vpack.c.bf16 %v2469_v51, %v2467_v50  ;;  %v3543_v58 = vld [vmem:[%s4310_s0 + $0x40] sm:$0xff]  ;;  %v3565_v60 = vld [vmem:[%s4310_s0 + $0x48] sm:$0xff] }
  0x44   :  { %v3533_v55 = vld [vmem:[%s4310_s0 + $0x78] sm:$0xff]  ;;  %v2697_v57 = vpack.c.bf16 %v2500_v54, %v2498_v53  ;;  %v3555_v59 = vld [vmem:[%s4310_s0 + $0x80] sm:$0xff]  ;;  %v3576_v61 = vld [vmem:[%s4310_s0 + $0x88] sm:$0xff] }
  0x45   :  { %2406 = vmatmul.mubr.msk.f32.gmra.mrb[2].mxu0 %vm118_vm3, %v3479_v39  ;;  %2666 = vmatpush1.bf16.msk.msra.mxu1 %vm3395_vm2, %v2664_v44  ;;  %v3584_v62 = vld [vmem:[%s4310_s0 + $0x50] sm:$0xff]  ;;  %v3600_v1 = vld [vmem:[%s4310_s0 + $0x58] sm:$0xff]  ;;  %v3616_v3 = vld [vmem:[%s4310_s0 + $0x60] sm:$0xff] }
  0x46   :  { %2686 = vmatpush1.bf16.msk.msra.mxu0 %vm3395_vm2, %v2684_v40  ;;  %707 = vmatprep.mubr.f32.mxu0 %v4320_v0  ;;  %v3592_v63 = vld [vmem:[%s4310_s0 + $0x90] sm:$0xff]  ;;  %v3608_v2 = vld [vmem:[%s4310_s0 + $0x98] sm:$0xff]  ;;  %v3657_v7 = vld [vmem:[%s4310_s0 + $0xc0] sm:$0xff] }
  0x47   :  { %2688 = vmatprep.subr.bf16.mxu0 %v2687_v41  ;;  %2955 = vmatprep.subr.bf16.mxu1 %v3382_v4  ;;  %v3624_v4 = vld [vmem:[%s4310_s0 + $0xa8] sm:$0xff]  ;;  %v3635_v5 = vld [vmem:[%s4310_s0 + $0xb0] sm:$0xff]  ;;  %v3646_v6 = vld [vmem:[%s4310_s0 + $0xb8] sm:$0xff] }
  0x48   :  { %2379 = vmatmul.mubr.msk.f32.vlgmr.msra.gmra.mrb[0].mxu1 %vm118_vm3, %v3518_v52  ;;  %v3696_v11 = vld [vmem:[%s4310_s0 + $0x10] sm:$0xff]  ;;  %v3707_v12 = vld [vmem:[%s4310_s0 + $0x18] sm:$0xff]  ;;  %v3718_v13 = vld [vmem:[%s4310_s0 + $0x20] sm:$0xff] }
  0x49   :  { %2439 = vmatmul.mubr.msk.f32.vlgmr.msra.gmra.mrb[0].mxu0 %vm118_vm3, %v3499_v45  ;;  %268 = vmatprep.mubr.f32.mxu1 %v4320_v0  ;;  %v3729_v14 = vld [vmem:[%s4310_s0 + $0x28] sm:$0xff]  ;;  %v2497_v17 = vld [vmem:[%s4311_s1 + $0x100] sm:$0xff]  ;;  %v2499_v18 = vld [vmem:[%s4311_s1 + $0x110] sm:$0xff] }
  0x4a   :  { %2690 = vmatpush1.bf16.msra.mxu0 %v2689_v46  ;;  %713 = vmatprep.mubr.f32.mxu0 %v4320_v0  ;;  %v3781_v16 = vld [vmem:[%s4310_s0 + $0x68] sm:$0xff]  ;;  %v2504_v20 = vld [vmem:[%s4311_s1 + $0x138] sm:$0xf]  ;;  %v2699_v21 = vpack.c.bf16 %v2499_v18, %v2497_v17  ;;  %v2501_v23 = vld [vmem:[%s4311_s1 + $0x120] sm:$0xff] }
  0x4b   :  { %2693 = vmatprep.subr.msk.bf16.mxu0 %vm3395_vm2, %v2691_v49  ;;  %2957 = vmatpush1.bf16.msra.mxu1 %v3393_v8  ;;  %v3668_v8 = vld [vmem:[%s4310_s0 + $0xc8] sm:$0xff]  ;;  %v2503_v24 = vld [vmem:[%s4311_s1 + $0x130] sm:$0xf]  ;;  %v93_v9 = vld [vmem:[%s4310_s0 + $0xa0] sm:$0xff] }
  0x4c   :  { %2956 = vmatprep.subr.msk.bf16.mxu1 %vm3395_vm2, %v3399_v10  ;;  %2380 = vmatmul.mubr.msk.f32.gmra.mrb[2].mxu1 %vm118_vm3, %v3543_v58  ;;  %v3679_v10 = vld [vmem:[%s4310_s0 + $0xd0] sm:$0xff]  ;;  %v2502_v19 = vld [vmem:[%s4311_s1 + $0x128] sm:$0xff]  ;;  %v2704_v25 = vpack.c.bf16 %v2503_v24, %v2501_v23  ;;  %v1584_v31 = vld [vmem:[#allocation2 + $0x218] sm:$0xff] }
  0x4d   :  { %2440 = vmatmul.mubr.msk.f32.gmra.mrb[2].mxu0 %vm118_vm3, %v3533_v55  ;;  %274 = vmatprep.mubr.f32.mxu1 %v4320_v0  ;;  %v2701_v22 = vpack.c.bf16 %v2504_v20, %v2502_v19  ;;  %v1582_v30 = vld [vmem:[#allocation2 + $0x208] sm:$0xff]  ;;  %v1581_v32 = vld [vmem:[#allocation2 + $0x200] sm:$0xff]  ;;  %v1583_v34 = vld [vmem:[#allocation2 + $0x210] sm:$0xff] }
  0x4e   :  { %719 = vmatprep.mubr.f32.mxu0 %v4320_v0  ;;  %2696 = vmatpush1.bf16.msk.msra.mxu0 %vm3395_vm2, %v2694_v56  ;;  %v2771_v33 = vpack.c.bf16 %v1584_v31, %v1582_v30  ;;  %v100_v35 = vld [vmem:[%s4310_s0 + $0xd8] sm:$0xff]  ;;  %v2773_v36 = vpack.c.bf16 %v1583_v34, %v1581_v32  ;;  %v1586_v37 = vld [vmem:[#allocation2 + $0x228] sm:$0xff]  ;;  %v1585_v40 = vld [vmem:[#allocation2 + $0x220] sm:$0xff] }
  0x4f   :  { %2698 = vmatprep.subr.bf16.mxu0 %v2697_v57  ;;  %2958 = vmatpush1.bf16.msk.msra.mxu1 %vm3395_vm2, %v3415_v15  ;;  %v3740_v15 = vld [vmem:[%s4310_s0 + $0x30] sm:$0xff]  ;;  %v1588_v38 = vld [vmem:[#allocation2 + $0x238] sm:$0xff]  ;;  %v1590_v43 = vld [vmem:[#allocation2 + $0x248] sm:$0xff] }
  0x50   :  { %2381 = vmatmul.mubr.msk.f32.gmra.mrb[4].mxu1 %vm118_vm3, %v3565_v60  ;;  %2772 = vmatprep.subr.bf16.mxu1 %v2771_v33  ;;  %v1587_v41 = vld [vmem:[#allocation2 + $0x230] sm:$0xff]  ;;  %v1592_v44 = vld [vmem:[#allocation2 + $0x258] sm:$0xff]  ;;  %v1589_v46 = vld [vmem:[#allocation2 + $0x240] sm:$0xff] }
  0x51   :  { %2441 = vmatmul.mubr.msk.f32.gmra.mrb[4].mxu0 %vm118_vm3, %v3555_v59  ;;  %280 = vmatprep.mubr.f32.mxu1 %v4320_v0  ;;  %v2777_v42 = vpack.c.bf16 %v1587_v41, %v1585_v40  ;;  %v1591_v47 = vld [vmem:[#allocation2 + $0x250] sm:$0xff]  ;;  %v1518_v49 = vld [vmem:[#allocation2 + $0x8] sm:$0xff]  ;;  %v1520_v50 = vld [vmem:[#allocation2 + $0x18] sm:$0xff] }
  0x52   :  { %725 = vmatprep.mubr.f32.mxu0 %v4320_v0  ;;  %v2781_v48 = vpack.c.bf16 %v1591_v47, %v1589_v46  ;;  %v2707_v51 = vpack.c.bf16 %v1520_v50, %v1518_v49  ;;  %v1519_v53 = vld [vmem:[#allocation2 + $0x10] sm:$0xff]  ;;  %v1594_v54 = vld [vmem:[#allocation2 + $0x268] sm:$0xff]  ;;  %v1593_v56 = vld [vmem:[#allocation2 + $0x260] sm:$0xff] }
  0x53   :  { %v1530_v17 = vld [vmem:[#allocation2 + $0x68] sm:$0xff]  ;;  %v1532_v18 = vld [vmem:[#allocation2 + $0x78] sm:$0xff]  ;;  %v1529_v20 = vld [vmem:[#allocation2 + $0x60] sm:$0xff] }
  0x54   :  { %2382 = vmatmul.mubr.msk.f32.gmra.mrb[6].mxu1 %vm118_vm3, %v3584_v62  ;;  %v2719_v19 = vpack.c.bf16 %v1532_v18, %v1530_v17  ;;  %v1602_v24 = vld [vmem:[#allocation2 + $0x2a8] sm:$0xff]  ;;  %v1603_v32 = vld [vmem:[#allocation2 + $0x2b0] sm:$0xff]  ;;  %v1536_v34 = vld [vmem:[#allocation2 + $0x98] sm:$0xff] }
  0x55   :  { %2442 = vmatmul.mubr.msk.f32.gmra.mrb[6].mxu0 %vm118_vm3, %v3576_v61  ;;  %286 = vmatprep.mubr.f32.mxu1 %v4320_v0  ;;  %v1534_v33 = vld [vmem:[#allocation2 + $0x88] sm:$0xff]  ;;  %v1539_v46 = vld [vmem:[#allocation2 + $0xb0] sm:$0xff]  ;;  %v1608_v50 = vld [vmem:[#allocation2 + $0x2d8] sm:$0xff] }
  0x56   :  { %731 = vmatprep.mubr.f32.mxu0 %v4320_v0  ;;  %v1538_v41 = vld [vmem:[#allocation2 + $0xa8] sm:$0xff]  ;;  %v1616_v17 = vld [vmem:[#allocation2 + $0x318] sm:$0xff]  ;;  %v1613_v18 = vld [vmem:[#allocation2 + $0x300] sm:$0xff] }
  0x57   :  { %v1606_v49 = vld [vmem:[#allocation2 + $0x2c8] sm:$0xff] }
  0x58   :  { %2383 = vmatmul.mubr.msk.f32.gmra.mrb[8].mxu1 %vm118_vm3, %v3600_v1 }
  0x59   :  { %2443 = vmatmul.mubr.msk.f32.gmra.mrb[8].mxu0 %vm118_vm3, %v3592_v63  ;;  %292 = vmatprep.mubr.f32.mxu1 %v4320_v0 }
  0x5a   :  { %737 = vmatprep.mubr.f32.mxu0 %v4320_v0 }
  0x5c   :  { %2384 = vmatmul.mubr.msk.f32.gmra.mrb[10].mxu1 %vm118_vm3, %v3616_v3 }
  0x5d   :  { %2444 = vmatmul.mubr.msk.f32.gmra.mrb[10].mxu0 %vm118_vm3, %v3608_v2  ;;  %298 = vmatprep.mubr.f32.mxu1 %v4320_v0 }
  0x5e   :  { %743 = vmatprep.mubr.f32.mxu0 %v4320_v0 }
  0x60   :  { %2385 = vmatmul.mubr.msk.f32.gmra.mrb[12].mxu1 %vm118_vm3, %v3499_v45 }
  0x61   :  { %2445 = vmatmul.mubr.msk.f32.gmra.mrb[12].mxu0 %vm118_vm3, %v3624_v4  ;;  %304 = vmatprep.mubr.f32.mxu1 %v4320_v0 }
  0x62   :  { %749 = vmatprep.mubr.f32.mxu0 %v4320_v0 }
  0x64   :  { %2386 = vmatmul.mubr.msk.f32.gmra.mrb[14].mxu1 %vm118_vm3, %v3533_v55 }
  0x65   :  { %2446 = vmatmul.mubr.msk.f32.gmra.mrb[14].mxu0 %vm118_vm3, %v3635_v5  ;;  %310 = vmatprep.mubr.f32.mxu1 %v4320_v0 }
  0x66   :  { %755 = vmatprep.mubr.f32.mxu0 %v4320_v0 }
  0x68   :  { %2387 = vmatmul.mubr.msk.f32.gmra.mrb[16].mxu1 %vm118_vm3, %v3555_v59 }
  0x69   :  { %2447 = vmatmul.mubr.msk.f32.gmra.mrb[16].mxu0 %vm118_vm3, %v3646_v6  ;;  %316 = vmatprep.mubr.f32.mxu1 %v4320_v0 }
  0x6a   :  { %761 = vmatprep.mubr.f32.mxu0 %v4320_v0 }
  0x6c   :  { %2388 = vmatmul.mubr.msk.f32.gmra.mrb[18].mxu1 %vm118_vm3, %v3576_v61 }
  0x6d   :  { %2448 = vmatmul.mubr.msk.f32.gmra.mrb[18].mxu0 %vm118_vm3, %v3657_v7  ;;  %322 = vmatprep.mubr.f32.mxu1 %v4320_v0 }
  0x6e   :  { %767 = vmatprep.mubr.f32.mxu0 %v4320_v0 }
  0x70   :  { %2389 = vmatmul.mubr.msk.f32.gmra.mrb[20].mxu1 %vm118_vm3, %v3592_v63 }
  0x71   :  { %2449 = vmatmul.mubr.msk.f32.gmra.mrb[20].mxu0 %vm118_vm3, %v3668_v8  ;;  %328 = vmatprep.mubr.f32.mxu1 %v4320_v0 }
  0x72   :  { %773 = vmatprep.mubr.f32.mxu0 %v4320_v0 }
  0x74   :  { %2390 = vmatmul.mubr.msk.f32.gmra.mrb[22].mxu1 %vm118_vm3, %v3608_v2 }
  0x75   :  { %2450 = vmatmul.mubr.msk.f32.gmra.mrb[22].mxu0 %vm118_vm3, %v3679_v10  ;;  %334 = vmatprep.mubr.f32.mxu1 %v4320_v0 }
  0x76   :  { %779 = vmatprep.mubr.f32.mxu0 %v4320_v0 }
  0x78   :  { %2391 = vmatmul.mubr.msk.f32.gmra.mrb[24].mxu1 %vm118_vm3, %v3624_v4 }
  0x79   :  { %2451 = vmatmul.mubr.msk.f32.gmra.mrb[24].mxu0 %vm118_vm3, %v3479_v39  ;;  %340 = vmatprep.mubr.f32.mxu1 %v4320_v0 }
  0x7a   :  { %785 = vmatprep.mubr.f32.mxu0 %v4320_v0 }
  0x7c   :  { %2392 = vmatmul.mubr.msk.f32.gmra.mrb[26].mxu1 %vm118_vm3, %v3635_v5 }
  0x7d   :  { %2452 = vmatmul.mubr.msk.f32.gmra.mrb[26].mxu0 %vm118_vm3, %v3696_v11  ;;  %346 = vmatprep.mubr.f32.mxu1 %v4320_v0 }
  0x7e   :  { %791 = vmatprep.mubr.f32.mxu0 %v4320_v0 }
  0x80   :  { %2393 = vmatmul.mubr.msk.f32.gmra.mrb[28].mxu1 %vm118_vm3, %v3646_v6 }
  0x81   :  { %2453 = vmatmul.mubr.msk.f32.gmra.mrb[28].mxu0 %vm118_vm3, %v3707_v12  ;;  %352 = vmatprep.mubr.f32.mxu1 %v4320_v0 }
  0x82   :  { %797 = vmatprep.mubr.f32.mxu0 %v4320_v0 }
  0x84   :  { %2394 = vmatmul.mubr.msk.f32.gmra.mrb[30].mxu1 %vm118_vm3, %v3657_v7 }
  0x85   :  { %2454 = vmatmul.mubr.msk.f32.gmra.mrb[30].mxu0 %vm118_vm3, %v3718_v13  ;;  %358 = vmatprep.mubr.f32.mxu1 %v4320_v0 }
  0x86   :  { %803 = vmatprep.mubr.f32.mxu0 %v4320_v0 }
  0x88   :  { %2395 = vmatmul.mubr.msk.f32.gmra.mrb[32].mxu1 %vm118_vm3, %v3668_v8 }
  0x89   :  { %2455 = vmatmul.mubr.msk.f32.gmra.mrb[32].mxu0 %vm118_vm3, %v3729_v14  ;;  %364 = vmatprep.mubr.f32.mxu1 %v4320_v0 }
  0x8a   :  { %809 = vmatprep.mubr.f32.mxu0 %v4320_v0 }
  0x8c   :  { %2396 = vmatmul.mubr.msk.f32.gmra.mrb[34].mxu1 %vm118_vm3, %v3679_v10 }
  0x8d   :  { %2456 = vmatmul.mubr.msk.f32.gmra.mrb[34].mxu0 %vm118_vm3, %v3740_v15  ;;  %370 = vmatprep.mubr.f32.mxu1 %v4320_v0 }
  0x8e   :  { %815 = vmatprep.mubr.f32.mxu0 %v4320_v0 }
  0x90   :  { %2397 = vmatmul.mubr.msk.f32.gmra.mrb[36].mxu1 %vm118_vm3, %v3479_v39 }
  0x91   :  { %2457 = vmatmul.mubr.msk.f32.gmra.mrb[36].mxu0 %vm118_vm3, %v3543_v58  ;;  %376 = vmatprep.mubr.f32.mxu1 %v4320_v0 }
  0x92   :  { %821 = vmatprep.mubr.f32.mxu0 %v4320_v0 }
  0x94   :  { %2398 = vmatmul.mubr.msk.f32.gmra.mrb[38].mxu1 %vm118_vm3, %v3696_v11 }
  0x95   :  { %2458 = vmatmul.mubr.msk.f32.gmra.mrb[38].mxu0 %vm118_vm3, %v3565_v60  ;;  %382 = vmatprep.mubr.f32.mxu1 %v4320_v0 }
  0x96   :  { %827 = vmatprep.mubr.f32.mxu0 %v4320_v0 }
  0x98   :  { %2399 = vmatmul.mubr.msk.f32.gmra.mrb[40].mxu1 %vm118_vm3, %v3707_v12 }
  0x99   :  { %2459 = vmatmul.mubr.msk.f32.gmra.mrb[40].mxu0 %vm118_vm3, %v3584_v62  ;;  %388 = vmatprep.mubr.f32.mxu1 %v4320_v0 }
  0x9a   :  { %833 = vmatprep.mubr.f32.mxu0 %v4320_v0 }
  0x9c   :  { %2400 = vmatmul.mubr.msk.f32.gmra.mrb[42].mxu1 %vm118_vm3, %v3718_v13 }
  0x9d   :  { %2460 = vmatmul.mubr.msk.f32.gmra.mrb[42].mxu0 %vm118_vm3, %v3600_v1  ;;  %394 = vmatprep.mubr.f32.mxu1 %v4320_v0 }
  0x9e   :  { %839 = vmatprep.mubr.f32.mxu0 %v4320_v0 }
  0xa0   :  { %2401 = vmatmul.mubr.msk.f32.gmra.mrb[44].mxu1 %vm118_vm3, %v3729_v14 }
  0xa1   :  { %2461 = vmatmul.mubr.msk.f32.gmra.mrb[44].mxu0 %vm118_vm3, %v3616_v3  ;;  %400 = vmatprep.mubr.f32.mxu1 %v4320_v0 }
  0xa2   :  { %845 = vmatprep.mubr.f32.mxu0 %v4320_v0 }
  0xa4   :  { %2402 = vmatmul.mubr.msk.f32.gmra.mrb[46].mxu1 %vm118_vm3, %v3740_v15 }
  0xa5   :  { %2462 = vmatmul.mubr.msk.f32.gmra.mrb[46].mxu0 %vm118_vm3, %v3781_v16  ;;  %492 = vmatprep.mubr.f32.mxu1 %v4320_v0 }
  0xa6   :  { %982 = vmatprep.mubr.f32.mxu0 %v4320_v0 }
  0xa8   :  { %2407 = vmatmul.mubr.msk.f32.vlgmr.msra.gmra.mrb[4].mxu1 %vm118_vm3, %v3696_v11 }
  0xa9   :  { %2473 = vmatmul.mubr.msk.f32.vlgmr.msra.gmra.mrb[0].mxu0 %vm118_vm3, %v3624_v4  ;;  %498 = vmatprep.mubr.f32.mxu1 %v4320_v0 }
  0xaa   :  { %2700 = vmatpush1.bf16.msra.mxu0 %v2699_v21  ;;  %988 = vmatprep.mubr.f32.mxu0 %v4320_v0  ;;  %v1531_v21 = vld [vmem:[#allocation2 + $0x70] sm:$0xff] }
  0xab   :  { %2703 = vmatprep.subr.msk.bf16.mxu0 %vm3395_vm2, %v2701_v22  ;;  %2774 = vmatpush1.bf16.msra.mxu1 %v2773_v36  ;;  %v2721_v22 = vpack.c.bf16 %v1531_v21, %v1529_v20  ;;  %v2723_v36 = vpack.c.bf16 %v1536_v34, %v1534_v33  ;;  %v1618_v21 = vld [vmem:[#allocation2 + $0x328] sm:$0xff] }
  0xac   :  { %2408 = vmatmul.mubr.msk.f32.gmra.mrb[6].mxu1 %vm118_vm3, %v3707_v12 }
  0xad   :  { %2474 = vmatmul.mubr.msk.f32.gmra.mrb[2].mxu0 %vm118_vm3, %v3635_v5  ;;  %504 = vmatprep.mubr.f32.mxu1 %v4320_v0 }
  0xae   :  { %994 = vmatprep.mubr.f32.mxu0 %v4320_v0  ;;  %2706 = vmatpush1.bf16.msk.msra.mxu0 %vm3395_vm2, %v2704_v25  ;;  %v1604_v25 = vld [vmem:[#allocation2 + $0x2b8] sm:$0xff] }
  0xaf   :  { %2708 = vmatprep.subr.bf16.mxu0 %v2707_v51  ;;  %v2791_v31 = vpack.c.bf16 %v1604_v25, %v1602_v24  ;;  %v1605_v51 = vld [vmem:[#allocation2 + $0x2c0] sm:$0xff]  ;;  %v1550_v24 = vld [vmem:[#allocation2 + $0x108] sm:$0xff] }
  0xb0   :  { %2409 = vmatmul.mubr.msk.f32.gmra.mrb[8].mxu1 %vm118_vm3, %v3718_v13 }
  0xb1   :  { %2475 = vmatmul.mubr.msk.f32.gmra.mrb[4].mxu0 %vm118_vm3, %v3646_v6  ;;  %510 = vmatprep.mubr.f32.mxu1 %v4320_v0 }
  0xb2   :  { %1000 = vmatprep.mubr.f32.mxu0 %v4320_v0 }
  0xb4   :  { %2410 = vmatmul.mubr.msk.f32.gmra.mrb[10].mxu1 %vm118_vm3, %v3729_v14 }
  0xb5   :  { %2476 = vmatmul.mubr.msk.f32.gmra.mrb[6].mxu0 %vm118_vm3, %v3657_v7  ;;  %516 = vmatprep.mubr.f32.mxu1 %v4320_v0 }
  0xb6   :  { %1006 = vmatprep.mubr.f32.mxu0 %v4320_v0 }
  0xb8   :  { %2411 = vmatmul.mubr.msk.f32.gmra.mrb[12].mxu1 %vm118_vm3, %v3518_v52  ;;  %v1517_v52 = vld [vmem:[#allocation2] sm:$0xff] }
  0xb9   :  { %2477 = vmatmul.mubr.msk.f32.gmra.mrb[8].mxu0 %vm118_vm3, %v3668_v8  ;;  %522 = vmatprep.mubr.f32.mxu1 %v4320_v0  ;;  %v2709_v57 = vpack.c.bf16 %v1519_v53, %v1517_v52  ;;  %v2795_v53 = vpack.c.bf16 %v1608_v50, %v1606_v49  ;;  %v1622_v49 = vld [vmem:[#allocation2 + $0x348] sm:$0xff]  ;;  %v1624_v50 = vld [vmem:[#allocation2 + $0x358] sm:$0xff] }
  0xba   :  { %1012 = vmatprep.mubr.f32.mxu0 %v4320_v0 }
  0xbc   :  { %2412 = vmatmul.mubr.msk.f32.gmra.mrb[14].mxu1 %vm118_vm3, %v3543_v58 }
  0xbd   :  { %2478 = vmatmul.mubr.msk.f32.gmra.mrb[10].mxu0 %vm118_vm3, %v3679_v10  ;;  %528 = vmatprep.mubr.f32.mxu1 %v4320_v0 }
  0xbe   :  { %1018 = vmatprep.mubr.f32.mxu0 %v4320_v0 }
  0xc0   :  { %2413 = vmatmul.mubr.msk.f32.gmra.mrb[16].mxu1 %vm118_vm3, %v3565_v60 }
  0xc1   :  { %2479 = vmatmul.mubr.msk.f32.gmra.mrb[12].mxu0 %vm118_vm3, %v3479_v39  ;;  %534 = vmatprep.mubr.f32.mxu1 %v4320_v0 }
  0xc2   :  { %1024 = vmatprep.mubr.f32.mxu0 %v4320_v0 }
  0xc4   :  { %2414 = vmatmul.mubr.msk.f32.gmra.mrb[18].mxu1 %vm118_vm3, %v3584_v62 }
  0xc5   :  { %2480 = vmatmul.mubr.msk.f32.gmra.mrb[14].mxu0 %vm118_vm3, %v3696_v11  ;;  %540 = vmatprep.mubr.f32.mxu1 %v4320_v0 }
  0xc6   :  { %1030 = vmatprep.mubr.f32.mxu0 %v4320_v0 }
  0xc8   :  { %2415 = vmatmul.mubr.msk.f32.gmra.mrb[20].mxu1 %vm118_vm3, %v3600_v1 }
  0xc9   :  { %2481 = vmatmul.mubr.msk.f32.gmra.mrb[16].mxu0 %vm118_vm3, %v3707_v12  ;;  %546 = vmatprep.mubr.f32.mxu1 %v4320_v0 }
  0xca   :  { %1036 = vmatprep.mubr.f32.mxu0 %v4320_v0 }
  0xcc   :  { %2416 = vmatmul.mubr.msk.f32.gmra.mrb[22].mxu1 %vm118_vm3, %v3616_v3 }
  0xcd   :  { %2482 = vmatmul.mubr.msk.f32.gmra.mrb[18].mxu0 %vm118_vm3, %v3718_v13  ;;  %552 = vmatprep.mubr.f32.mxu1 %v4320_v0 }
  0xce   :  { %1042 = vmatprep.mubr.f32.mxu0 %v4320_v0 }
  0xd0   :  { %2417 = vmatmul.mubr.msk.f32.gmra.mrb[24].mxu1 %vm118_vm3, %v3499_v45  ;;  %v2779_v45 = vpack.c.bf16 %v1592_v44, %v1590_v43 }
  0xd1   :  { %2483 = vmatmul.mubr.msk.f32.gmra.mrb[20].mxu0 %vm118_vm3, %v3729_v14  ;;  %558 = vmatprep.mubr.f32.mxu1 %v4320_v0 }
  0xd2   :  { %1048 = vmatprep.mubr.f32.mxu0 %v4320_v0 }
  0xd4   :  { %2418 = vmatmul.mubr.msk.f32.gmra.mrb[26].mxu1 %vm118_vm3, %v3533_v55 }
  0xd5   :  { %2484 = vmatmul.mubr.msk.f32.gmra.mrb[22].mxu0 %vm118_vm3, %v3740_v15  ;;  %564 = vmatprep.mubr.f32.mxu1 %v4320_v0 }
  0xd6   :  { %1054 = vmatprep.mubr.f32.mxu0 %v4320_v0 }
  0xd8   :  { %2419 = vmatmul.mubr.msk.f32.gmra.mrb[28].mxu1 %vm118_vm3, %v3555_v59 }
  0xd9   :  { %2485 = vmatmul.mubr.msk.f32.gmra.mrb[24].mxu0 %vm118_vm3, %v3543_v58  ;;  %570 = vmatprep.mubr.f32.mxu1 %v4320_v0 }
  0xda   :  { %1060 = vmatprep.mubr.f32.mxu0 %v4320_v0 }
  0xdc   :  { %2420 = vmatmul.mubr.msk.f32.gmra.mrb[30].mxu1 %vm118_vm3, %v3576_v61 }
  0xdd   :  { %2486 = vmatmul.mubr.msk.f32.gmra.mrb[26].mxu0 %vm118_vm3, %v3565_v60  ;;  %576 = vmatprep.mubr.f32.mxu1 %v4320_v0 }
  0xde   :  { %1066 = vmatprep.mubr.f32.mxu0 %v4320_v0 }
  0xe0   :  { %2421 = vmatmul.mubr.msk.f32.gmra.mrb[32].mxu1 %vm118_vm3, %v3592_v63 }
  0xe1   :  { %2487 = vmatmul.mubr.msk.f32.gmra.mrb[28].mxu0 %vm118_vm3, %v3584_v62  ;;  %582 = vmatprep.mubr.f32.mxu1 %v4320_v0 }
  0xe2   :  { %1072 = vmatprep.mubr.f32.mxu0 %v4320_v0 }
  0xe4   :  { %2422 = vmatmul.mubr.msk.f32.gmra.mrb[34].mxu1 %vm118_vm3, %v3608_v2 }
  0xe5   :  { %2488 = vmatmul.mubr.msk.f32.gmra.mrb[30].mxu0 %vm118_vm3, %v3600_v1  ;;  %588 = vmatprep.mubr.f32.mxu1 %v4320_v0 }
  0xe6   :  { %1078 = vmatprep.mubr.f32.mxu0 %v4320_v0 }
  0xe8   :  { %2423 = vmatmul.mubr.msk.f32.gmra.mrb[36].mxu1 %vm118_vm3, %v3624_v4  ;;  %v1600_v4 = vld [vmem:[#allocation2 + $0x298] sm:$0xff] }
  0xe9   :  { %2489 = vmatmul.mubr.msk.f32.gmra.mrb[32].mxu0 %vm118_vm3, %v3616_v3  ;;  %594 = vmatprep.mubr.f32.mxu1 %v4320_v0 }
  0xea   :  { %1084 = vmatprep.mubr.f32.mxu0 %v4320_v0 }
  0xec   :  { %2424 = vmatmul.mubr.msk.f32.gmra.mrb[38].mxu1 %vm118_vm3, %v3635_v5 }
  0xed   :  { %2490 = vmatmul.mubr.msk.f32.gmra.mrb[34].mxu0 %vm118_vm3, %v3781_v16  ;;  %600 = vmatprep.mubr.f32.mxu1 %v4320_v0 }
  0xee   :  { %1090 = vmatprep.mubr.f32.mxu0 %v4320_v0 }
  0xf0   :  { %2425 = vmatmul.mubr.msk.f32.gmra.mrb[40].mxu1 %vm118_vm3, %v3646_v6 }
  0xf1   :  { %2491 = vmatmul.mubr.msk.f32.gmra.mrb[36].mxu0 %vm118_vm3, %v3533_v55  ;;  %606 = vmatprep.mubr.f32.mxu1 %v4320_v0 }
  0xf2   :  { %1096 = vmatprep.mubr.f32.mxu0 %v4320_v0 }
  0xf4   :  { %2426 = vmatmul.mubr.msk.f32.gmra.mrb[42].mxu1 %vm118_vm3, %v3657_v7 }
  0xf5   :  { %2492 = vmatmul.mubr.msk.f32.gmra.mrb[38].mxu0 %vm118_vm3, %v3555_v59  ;;  %612 = vmatprep.mubr.f32.mxu1 %v4320_v0 }
  0xf6   :  { %1102 = vmatprep.mubr.f32.mxu0 %v4320_v0 }
  0xf8   :  { %2427 = vmatmul.mubr.msk.f32.gmra.mrb[44].mxu1 %vm118_vm3, %v3668_v8 }
  0xf9   :  { %2493 = vmatmul.mubr.msk.f32.gmra.mrb[40].mxu0 %vm118_vm3, %v3576_v61  ;;  %618 = vmatprep.mubr.f32.mxu1 %v4320_v0 }
  0xfa   :  { %1108 = vmatprep.mubr.f32.mxu0 %v4320_v0 }
  0xfc   :  { %2428 = vmatmul.mubr.msk.f32.gmra.mrb[46].mxu1 %vm118_vm3, %v3679_v10 }
  0xfd   :  { %2494 = vmatmul.mubr.msk.f32.gmra.mrb[42].mxu0 %vm118_vm3, %v3592_v63 }
  0xfe   :  { %1114 = vmatprep.mubr.f32.mxu0 %v4320_v0 }
 0x101   :  { %2495 = vmatmul.mubr.msk.f32.gmra.mrb[44].mxu0 %vm118_vm3, %v3608_v2 }
 0x102   :  { %1120 = vmatprep.mubr.f32.mxu0 %v4320_v0 }
 0x105   :  { %2496 = vmatmul.mubr.msk.f32.gmra.mrb[46].mxu0 %vm118_vm3, %v93_v9 }
 0x106   :  { %1257 = vmatprep.mubr.f32.mxu0 %v4320_v0 }
 0x109   :  { %2507 = vmatmul.mubr.msk.f32.vlgmr.msra.gmra.mrb[0].mxu0 %vm118_vm3, %v3479_v39  ;;  %v2775_v39 = vpack.c.bf16 %v1588_v38, %v1586_v37  ;;  %v1533_v37 = vld [vmem:[#allocation2 + $0x80] sm:$0xff]  ;;  %v1535_v38 = vld [vmem:[#allocation2 + $0x90] sm:$0xff] }
 0x10a   :  { %1263 = vmatprep.mubr.f32.mxu0 %v4320_v0  ;;  %2710 = vmatpush1.bf16.msra.mxu0 %v2709_v57 }
 0x10b   :  { %2776 = vmatprep.subr.bf16.mxu1 %v2775_v39  ;;  %v2725_v39 = vpack.c.bf16 %v1535_v38, %v1533_v37  ;;  %v1551_v37 = vld [vmem:[#allocation2 + $0x110] sm:$0xff]  ;;  %v1554_v38 = vld [vmem:[#allocation2 + $0x128] sm:$0xff] }
 0x10c   :  { %2778 = vmatpush1.bf16.msra.mxu1 %v2777_v42  ;;  %v1540_v42 = vld [vmem:[#allocation2 + $0xb8] sm:$0xff] }
 0x10d   :  { %2508 = vmatmul.mubr.msk.f32.gmra.mrb[2].mxu0 %vm118_vm3, %v3696_v11  ;;  %2780 = vmatprep.subr.bf16.mxu1 %v2779_v45  ;;  %v1526_v11 = vld [vmem:[#allocation2 + $0x48] sm:$0xff]  ;;  %v2727_v44 = vpack.c.bf16 %v1540_v42, %v1538_v41  ;;  %v1537_v45 = vld [vmem:[#allocation2 + $0xa0] sm:$0xff]  ;;  %v1556_v42 = vld [vmem:[#allocation2 + $0x138] sm:$0xff] }
 0x10e   :  { %1269 = vmatprep.mubr.f32.mxu0 %v4320_v0  ;;  %v2729_v47 = vpack.c.bf16 %v1539_v46, %v1537_v45  ;;  %v1555_v45 = vld [vmem:[#allocation2 + $0x130] sm:$0xff]  ;;  %v2743_v46 = vpack.c.bf16 %v1556_v42, %v1554_v38 }
 0x10f   :  { %v1631_v38 = vld [vmem:[#allocation2 + $0x390] sm:$0xff] }
 0x110   :  { %2782 = vmatpush1.bf16.msra.mxu1 %v2781_v48 }
 0x111   :  { %2509 = vmatmul.mubr.msk.f32.gmra.mrb[4].mxu0 %vm118_vm3, %v3707_v12  ;;  %v1528_v12 = vld [vmem:[#allocation2 + $0x58] sm:$0xff] }
 0x112   :  { %1275 = vmatprep.mubr.f32.mxu0 %v4320_v0 }
 0x115   :  { %2510 = vmatmul.mubr.msk.f32.gmra.mrb[6].mxu0 %vm118_vm3, %v3718_v13  ;;  %v2715_v13 = vpack.c.bf16 %v1528_v12, %v1526_v11  ;;  %v1609_v12 = vld [vmem:[#allocation2 + $0x2e0] sm:$0xff] }
 0x116   :  { %1281 = vmatprep.mubr.f32.mxu0 %v4320_v0 }
 0x119   :  { %2511 = vmatmul.mubr.msk.f32.gmra.mrb[8].mxu0 %vm118_vm3, %v3729_v14  ;;  %v1525_v14 = vld [vmem:[#allocation2 + $0x40] sm:$0xff] }
 0x11a   :  { %1287 = vmatprep.mubr.f32.mxu0 %v4320_v0 }
 0x11b   :  { %v3971_v26 = vpop.f32.mrb[0].mxu1 }
 0x11c   :  { %v3973_v27 = vpop.f32.mrb[1].mxu1 }
 0x11d   :  { %2512 = vmatmul.mubr.msk.f32.gmra.mrb[10].mxu0 %vm118_vm3, %v3740_v15  ;;  %v1527_v15 = vld [vmem:[#allocation2 + $0x50] sm:$0xff] }
 0x11e   :  { %1293 = vmatprep.mubr.f32.mxu0 %v4320_v0 }
 0x11f   :  { %v3978_v28 = vpop.f32.mrb[2].mxu1 }
 0x120   :  { %v3980_v29 = vpop.f32.mrb[3].mxu1 }
 0x121   :  { %2513 = vmatmul.mubr.msk.f32.gmra.mrb[12].mxu0 %vm118_vm3, %v3543_v58 }
 0x122   :  { %1299 = vmatprep.mubr.f32.mxu0 %v4320_v0 }
 0x125   :  { %2514 = vmatmul.mubr.msk.f32.gmra.mrb[14].mxu0 %vm118_vm3, %v3565_v60 }
 0x126   :  { %1305 = vmatprep.mubr.f32.mxu0 %v4320_v0 }
 0x129   :  { %2515 = vmatmul.mubr.msk.f32.gmra.mrb[16].mxu0 %vm118_vm3, %v3584_v62  ;;  %v1524_v62 = vld [vmem:[#allocation2 + $0x38] sm:$0xff] }
 0x12a   :  { %1311 = vmatprep.mubr.f32.mxu0 %v4320_v0 }
 0x12d   :  { %2516 = vmatmul.mubr.msk.f32.gmra.mrb[18].mxu0 %vm118_vm3, %v3600_v1  ;;  %v1521_v1 = vld [vmem:[#allocation2 + $0x20] sm:$0xff] }
 0x12e   :  { %1317 = vmatprep.mubr.f32.mxu0 %v4320_v0 }
 0x131   :  { %2517 = vmatmul.mubr.msk.f32.gmra.mrb[20].mxu0 %vm118_vm3, %v3616_v3  ;;  %v1598_v3 = vld [vmem:[#allocation2 + $0x288] sm:$0xff] }
 0x132   :  { %1323 = vmatprep.mubr.f32.mxu0 %v4320_v0 }
 0x135   :  { %2518 = vmatmul.mubr.msk.f32.gmra.mrb[22].mxu0 %vm118_vm3, %v3781_v16  ;;  %v2717_v16 = vpack.c.bf16 %v1527_v15, %v1525_v14  ;;  %v1614_v14 = vld [vmem:[#allocation2 + $0x308] sm:$0xff] }
 0x136   :  { %1329 = vmatprep.mubr.f32.mxu0 %v4320_v0  ;;  %v2803_v20 = vpack.c.bf16 %v1616_v17, %v1614_v14  ;;  %v1628_v14 = vld [vmem:[#allocation2 + $0x378] sm:$0xff] }
 0x139   :  { %2519 = vmatmul.mubr.msk.f32.gmra.mrb[24].mxu0 %vm118_vm3, %v3533_v55  ;;  %v1596_v55 = vld [vmem:[#allocation2 + $0x278] sm:$0xff] }
 0x13a   :  { %1335 = vmatprep.mubr.f32.mxu0 %v4320_v0  ;;  %v2783_v58 = vpack.c.bf16 %v1596_v55, %v1594_v54  ;;  %v1607_v54 = vld [vmem:[#allocation2 + $0x2d0] sm:$0xff]  ;;  %v1542_v55 = vld [vmem:[#allocation2 + $0xc8] sm:$0xff] }
 0x13b   :  { %v2797_v57 = vpack.c.bf16 %v1607_v54, %v1605_v51  ;;  %v2811_v54 = vpack.c.bf16 %v1624_v50, %v1622_v49  ;;  %v1569_v50 = vld [vmem:[#allocation2 + $0x1a0] sm:$0xff] }
 0x13c   :  { %2784 = vmatprep.subr.bf16.mxu1 %v2783_v58 }
 0x13d   :  { %2520 = vmatmul.mubr.msk.f32.gmra.mrb[26].mxu0 %vm118_vm3, %v3555_v59  ;;  %v1595_v59 = vld [vmem:[#allocation2 + $0x270] sm:$0xff] }
 0x13e   :  { %1341 = vmatprep.mubr.f32.mxu0 %v4320_v0  ;;  %v2785_v60 = vpack.c.bf16 %v1595_v59, %v1593_v56  ;;  %v1544_v56 = vld [vmem:[#allocation2 + $0xd8] sm:$0xff]  ;;  %v1541_v59 = vld [vmem:[#allocation2 + $0xc0] sm:$0xff] }
 0x13f   :  { %v2731_v58 = vpack.c.bf16 %v1544_v56, %v1542_v55  ;;  %v1558_v55 = vld [vmem:[#allocation2 + $0x148] sm:$0xff]  ;;  %v1560_v56 = vld [vmem:[#allocation2 + $0x158] sm:$0xff] }
 0x140   :  { %2786 = vmatpush1.bf16.msra.mxu1 %v2785_v60  ;;  %v1543_v60 = vld [vmem:[#allocation2 + $0xd0] sm:$0xff] }
 0x141   :  { %2521 = vmatmul.mubr.msk.f32.gmra.mrb[28].mxu0 %vm118_vm3, %v3576_v61  ;;  %v1522_v61 = vld [vmem:[#allocation2 + $0x28] sm:$0xff] }
 0x142   :  { %1347 = vmatprep.mubr.f32.mxu0 %v4320_v0 }
 0x145   :  { %2522 = vmatmul.mubr.msk.f32.gmra.mrb[30].mxu0 %vm118_vm3, %v3592_v63  ;;  %v2711_v63 = vpack.c.bf16 %v1524_v62, %v1522_v61  ;;  %v2733_v61 = vpack.c.bf16 %v1543_v60, %v1541_v59  ;;  %v1557_v59 = vld [vmem:[#allocation2 + $0x140] sm:$0xff]  ;;  %v1559_v60 = vld [vmem:[#allocation2 + $0x150] sm:$0xff] }
 0x146   :  { %1353 = vmatprep.mubr.f32.mxu0 %v4320_v0 }
 0x147   :  { %2712 = vmatprep.subr.bf16.mxu0 %v2711_v63  ;;  %v1610_v63 = vld [vmem:[#allocation2 + $0x2e8] sm:$0xff] }
 0x149   :  { %2523 = vmatmul.mubr.msk.f32.gmra.mrb[32].mxu0 %vm118_vm3, %v3608_v2  ;;  %v1523_v2 = vld [vmem:[#allocation2 + $0x30] sm:$0xff] }
 0x14a   :  { %1359 = vmatprep.mubr.f32.mxu0 %v4320_v0 }
 0x14d   :  { %2524 = vmatmul.mubr.msk.f32.gmra.mrb[34].mxu0 %vm118_vm3, %v93_v9  ;;  %v1601_v9 = vld [vmem:[#allocation2 + $0x2a0] sm:$0xff] }
 0x14e   :  { %1365 = vmatprep.mubr.f32.mxu0 %v4320_v0 }
 0x151   :  { %2525 = vmatmul.mubr.msk.f32.gmra.mrb[36].mxu0 %vm118_vm3, %v3635_v5  ;;  %v2713_v5 = vpack.c.bf16 %v1523_v2, %v1521_v1  ;;  %v1612_v1 = vld [vmem:[#allocation2 + $0x2f8] sm:$0xff]  ;;  %v1546_v2 = vld [vmem:[#allocation2 + $0xe8] sm:$0xff] }
 0x152   :  { %1371 = vmatprep.mubr.f32.mxu0 %v4320_v0 }
 0x153   :  { %2714 = vmatpush1.bf16.msra.mxu0 %v2713_v5  ;;  %v1548_v5 = vld [vmem:[#allocation2 + $0xf8] sm:$0xff] }
 0x154   :  { %2716 = vmatprep.subr.bf16.mxu0 %v2715_v13  ;;  %v1611_v13 = vld [vmem:[#allocation2 + $0x2f0] sm:$0xff] }
 0x155   :  { %2526 = vmatmul.mubr.msk.f32.gmra.mrb[38].mxu0 %vm118_vm3, %v3646_v6  ;;  %v2787_v6 = vpack.c.bf16 %v1600_v4, %v1598_v3  ;;  %v2799_v4 = vpack.c.bf16 %v1612_v1, %v1610_v63  ;;  %v1623_v63 = vld [vmem:[#allocation2 + $0x350] sm:$0xff] }
 0x156   :  { %1377 = vmatprep.mubr.f32.mxu0 %v4320_v0 }
 0x157   :  { %2788 = vmatprep.subr.bf16.mxu1 %v2787_v6  ;;  %2718 = vmatpush1.bf16.msra.mxu0 %v2717_v16  ;;  %v1545_v6 = vld [vmem:[#allocation2 + $0xe0] sm:$0xff]  ;;  %v2801_v16 = vpack.c.bf16 %v1611_v13, %v1609_v12  ;;  %v1563_v12 = vld [vmem:[#allocation2 + $0x170] sm:$0xff]  ;;  %v1626_v13 = vld [vmem:[#allocation2 + $0x368] sm:$0xff] }
 0x158   :  { %2720 = vmatprep.subr.bf16.mxu0 %v2719_v19  ;;  %v1615_v19 = vld [vmem:[#allocation2 + $0x310] sm:$0xff]  ;;  %v2815_v17 = vpack.c.bf16 %v1628_v14, %v1626_v13  ;;  %v1638_v14 = vld [vmem:[#allocation2 + $0x3c8] sm:$0xff] }
 0x159   :  { %2527 = vmatmul.mubr.msk.f32.gmra.mrb[40].mxu0 %vm118_vm3, %v3657_v7  ;;  %v1597_v7 = vld [vmem:[#allocation2 + $0x280] sm:$0xff]  ;;  %v2805_v25 = vpack.c.bf16 %v1615_v19, %v1613_v18  ;;  %v1627_v18 = vld [vmem:[#allocation2 + $0x370] sm:$0xff] }
 0x15a   :  { %1383 = vmatprep.mubr.f32.mxu0 %v4320_v0 }
 0x15b   :  { %2722 = vmatpush1.bf16.msra.mxu0 %v2721_v22  ;;  %v1620_v22 = vld [vmem:[#allocation2 + $0x338] sm:$0xff] }
 0x15c   :  { %2724 = vmatprep.subr.bf16.mxu0 %v2723_v36  ;;  %v2807_v34 = vpack.c.bf16 %v1620_v22, %v1618_v21  ;;  %v1549_v36 = vld [vmem:[#allocation2 + $0x100] sm:$0xff]  ;;  %v1566_v22 = vld [vmem:[#allocation2 + $0x188] sm:$0xff] }
 0x15d   :  { %2528 = vmatmul.mubr.msk.f32.gmra.mrb[42].mxu0 %vm118_vm3, %v3668_v8  ;;  %v1599_v8 = vld [vmem:[#allocation2 + $0x290] sm:$0xff]  ;;  %v2741_v41 = vpack.c.bf16 %v1551_v37, %v1549_v36  ;;  %v1629_v37 = vld [vmem:[#allocation2 + $0x380] sm:$0xff] }
 0x15e   :  { %1389 = vmatprep.mubr.f32.mxu0 %v4320_v0 }
 0x15f   :  { %2726 = vmatpush1.bf16.msra.mxu0 %v2725_v39 }
 0x160   :  { %2728 = vmatprep.subr.bf16.mxu0 %v2727_v44  ;;  %v1553_v44 = vld [vmem:[#allocation2 + $0x120] sm:$0xff] }
 0x161   :  { %2529 = vmatmul.mubr.msk.f32.gmra.mrb[44].mxu0 %vm118_vm3, %v3679_v10  ;;  %v2789_v10 = vpack.c.bf16 %v1599_v8, %v1597_v7  ;;  %v1547_v7 = vld [vmem:[#allocation2 + $0xf0] sm:$0xff]  ;;  %v2735_v8 = vpack.c.bf16 %v1548_v5, %v1546_v2  ;;  %v2745_v51 = vpack.c.bf16 %v1555_v45, %v1553_v44  ;;  %v2749_v2 = vpack.c.bf16 %v1559_v60, %v1557_v59  ;;  %v1562_v5 = vld [vmem:[#allocation2 + $0x168] sm:$0xff] }
 0x162   :  { %1395 = vmatprep.mubr.f32.mxu0 %v4320_v0  ;;  %v2821_v44 = vpack.c.bf16 %v1631_v38, %v1629_v37  ;;  %v1570_v45 = vld [vmem:[#allocation2 + $0x1a8] sm:$0xff]  ;;  %v1644_v38 = vld [vmem:[#allocation2 + $0x3f8] sm:$0xff] }
 0x163   :  { %2790 = vmatpush1.bf16.msra.mxu1 %v2789_v10  ;;  %2730 = vmatpush1.bf16.msra.mxu0 %v2729_v47  ;;  %v2737_v10 = vpack.c.bf16 %v1547_v7, %v1545_v6  ;;  %v1564_v6 = vld [vmem:[#allocation2 + $0x178] sm:$0xff]  ;;  %v1574_v59 = vld [vmem:[#allocation2 + $0x1c8] sm:$0xff] }
 0x164   :  { %2792 = vmatprep.subr.bf16.mxu1 %v2791_v31  ;;  %2732 = vmatprep.subr.bf16.mxu0 %v2731_v58  ;;  %v1619_v31 = vld [vmem:[#allocation2 + $0x330] sm:$0xff]  ;;  %v2747_v58 = vpack.c.bf16 %v1560_v56, %v1558_v55  ;;  %v1634_v56 = vld [vmem:[#allocation2 + $0x3a8] sm:$0xff] }
 0x165   :  { %2530 = vmatmul.mubr.msk.f32.gmra.mrb[46].mxu0 %vm118_vm3, %v100_v35  ;;  %v2793_v35 = vpack.c.bf16 %v1603_v32, %v1601_v9  ;;  %v1617_v9 = vld [vmem:[#allocation2 + $0x320] sm:$0xff]  ;;  %v1552_v32 = vld [vmem:[#allocation2 + $0x118] sm:$0xff]  ;;  %v1642_v37 = vld [vmem:[#allocation2 + $0x3e8] sm:$0xff] }
 0x166   :  { %v2809_v47 = vpack.c.bf16 %v1619_v31, %v1617_v9  ;;  %v1565_v31 = vld [vmem:[#allocation2 + $0x180] sm:$0xff] }
 0x167   :  { %2794 = vmatpush1.bf16.msra.mxu1 %v2793_v35  ;;  %2734 = vmatpush1.bf16.msra.mxu0 %v2733_v61  ;;  %v2739_v35 = vpack.c.bf16 %v1552_v32, %v1550_v24  ;;  %v1621_v61 = vld [vmem:[#allocation2 + $0x340] sm:$0xff]  ;;  %v1568_v24 = vld [vmem:[#allocation2 + $0x198] sm:$0xff]  ;;  %v1567_v32 = vld [vmem:[#allocation2 + $0x190] sm:$0xff] }
 0x168   :  { %2796 = vmatprep.subr.bf16.mxu1 %v2795_v53  ;;  %2736 = vmatprep.subr.bf16.mxu0 %v2735_v8  ;;  %v2813_v1 = vpack.c.bf16 %v1623_v63, %v1621_v61  ;;  %v2751_v8 = vpack.c.bf16 %v1564_v6, %v1562_v5  ;;  %v2755_v9 = vpack.c.bf16 %v1568_v24, %v1566_v22  ;;  %v1633_v63 = vld [vmem:[#allocation2 + $0x3a0] sm:$0xff]  ;;  %v1639_v22 = vld [vmem:[#allocation2 + $0x3d0] sm:$0xff]  ;;  %v1580_v24 = vld [vmem:[#allocation2 + $0x1f8] sm:$0xff] }
 0x16b   :  { %2798 = vmatpush1.bf16.msra.mxu1 %v2797_v57  ;;  %2738 = vmatpush1.bf16.msra.mxu0 %v2737_v10  ;;  %v1561_v10 = vld [vmem:[#allocation2 + $0x160] sm:$0xff] }
 0x16c   :  { %2800 = vmatprep.subr.bf16.mxu1 %v2799_v4  ;;  %2740 = vmatprep.subr.bf16.mxu0 %v2739_v35  ;;  %v2753_v19 = vpack.c.bf16 %v1563_v12, %v1561_v10  ;;  %v1632_v35 = vld [vmem:[#allocation2 + $0x398] sm:$0xff]  ;;  %v1575_v10 = vld [vmem:[#allocation2 + $0x1d0] sm:$0xff] }
 0x16f   :  { %2802 = vmatpush1.bf16.msra.mxu1 %v2801_v16  ;;  %2742 = vmatpush1.bf16.msra.mxu0 %v2741_v41  ;;  %v1625_v16 = vld [vmem:[#allocation2 + $0x360] sm:$0xff]  ;;  %v2757_v41 = vpack.c.bf16 %v1567_v32, %v1565_v31 }
 0x170   :  { %2804 = vmatprep.subr.bf16.mxu1 %v2803_v20  ;;  %2744 = vmatprep.subr.bf16.mxu0 %v2743_v46  ;;  %v2817_v21 = vpack.c.bf16 %v1627_v18, %v1625_v16  ;;  %v1572_v46 = vld [vmem:[#allocation2 + $0x1b8] sm:$0xff]  ;;  %v1577_v32 = vld [vmem:[#allocation2 + $0x1e0] sm:$0xff] }
 0x171   :  { %v2759_v49 = vpack.c.bf16 %v1572_v46, %v1570_v45  ;;  %v1640_v16 = vld [vmem:[#allocation2 + $0x3d8] sm:$0xff]  ;;  %v1641_v45 = vld [vmem:[#allocation2 + $0x3e0] sm:$0xff]  ;;  %v1643_v46 = vld [vmem:[#allocation2 + $0x3f0] sm:$0xff] }
 0x173   :  { %2806 = vmatpush1.bf16.msra.mxu1 %v2805_v25  ;;  %2746 = vmatpush1.bf16.msra.mxu0 %v2745_v51  ;;  %v1571_v51 = vld [vmem:[#allocation2 + $0x1b0] sm:$0xff] }
 0x174   :  { %2808 = vmatprep.subr.bf16.mxu1 %v2807_v34  ;;  %2748 = vmatprep.subr.bf16.mxu0 %v2747_v58  ;;  %v1630_v34 = vld [vmem:[#allocation2 + $0x388] sm:$0xff]  ;;  %v1636_v58 = vld [vmem:[#allocation2 + $0x3b8] sm:$0xff] }
 0x175   :  { %v2819_v36 = vpack.c.bf16 %v1632_v35, %v1630_v34  ;;  %v2823_v61 = vpack.c.bf16 %v1636_v58, %v1634_v56  ;;  %v1579_v34 = vld [vmem:[#allocation2 + $0x1f0] sm:$0xff] }
 0x176   :  { %v2769_v35 = vpack.c.bf16 %v1579_v34, %v1577_v32 }
 0x177   :  { %2810 = vmatpush1.bf16.msra.mxu1 %v2809_v47  ;;  %2750 = vmatpush1.bf16.msra.mxu0 %v2749_v2  ;;  %v1576_v2 = vld [vmem:[#allocation2 + $0x1d8] sm:$0xff] }
 0x178   :  { %2812 = vmatprep.subr.bf16.mxu1 %v2811_v54  ;;  %2752 = vmatprep.subr.bf16.mxu0 %v2751_v8  ;;  %v2761_v54 = vpack.c.bf16 %v1571_v51, %v1569_v50  ;;  %v2763_v6 = vpack.c.bf16 %v1576_v2, %v1574_v59  ;;  %v1573_v8 = vld [vmem:[#allocation2 + $0x1c0] sm:$0xff]  ;;  %v1646_v51 = vld [vmem:[#allocation2 + $0x408] sm:$0xff] }
 0x179   :  { %v2765_v12 = vpack.c.bf16 %v1575_v10, %v1573_v8 }
 0x17b   :  { %v4033_v23 = vpop.f32.mrb[4].mxu1  ;;  %2814 = vmatpush1.bf16.msra.mxu1 %v2813_v1  ;;  %2754 = vmatpush1.bf16.msra.mxu0 %v2753_v19  ;;  %v1635_v1 = vld [vmem:[#allocation2 + $0x3b0] sm:$0xff]  ;;  %v2827_v19 = vpack.c.bf16 %v1640_v16, %v1638_v14 }
 0x17c   :  { %v4035_v30 = vpop.f32.mrb[5].mxu1  ;;  %2816 = vmatprep.subr.bf16.mxu1 %v2815_v17  ;;  %2756 = vmatprep.subr.bf16.mxu0 %v2755_v9  ;;  %v2825_v5 = vpack.c.bf16 %v1635_v1, %v1633_v63  ;;  %v1578_v17 = vld [vmem:[#allocation2 + $0x1e8] sm:$0xff] }
 0x17d   :  { %v2767_v31 = vpack.c.bf16 %v1580_v24, %v1578_v17 }
 0x17f   :  { %v4037_v40 = vpop.f32.mrb[6].mxu1  ;;  %2818 = vmatpush1.bf16.msra.mxu1 %v2817_v21  ;;  %2758 = vmatpush1.bf16.msra.mxu0 %v2757_v41  ;;  %v1637_v21 = vld [vmem:[#allocation2 + $0x3c0] sm:$0xff] }
 0x180   :  { %v4039_v43 = vpop.f32.mrb[7].mxu1  ;;  %2820 = vmatprep.subr.bf16.mxu1 %v2819_v36  ;;  %2760 = vmatprep.subr.bf16.mxu0 %v2759_v49  ;;  %v2829_v9 = vpack.c.bf16 %v1639_v22, %v1637_v21  ;;  %v2833_v49 = vpack.c.bf16 %v1643_v46, %v1641_v45 }
 0x183   :  { %v4041_v48 = vpop.f32.mrb[8].mxu1  ;;  %2822 = vmatpush1.bf16.msra.mxu1 %v2821_v44  ;;  %2762 = vmatpush1.bf16.msra.mxu0 %v2761_v54  ;;  %v2831_v44 = vpack.c.bf16 %v1644_v38, %v1642_v37  ;;  %v1648_v54 = vld [vmem:[#allocation2 + $0x418] sm:$0xff] }
 0x184   :  { %v4043_v52 = vpop.f32.mrb[9].mxu1  ;;  %2824 = vmatprep.subr.bf16.mxu1 %v2823_v61  ;;  %2764 = vmatprep.subr.bf16.mxu0 %v2763_v6  ;;  %v2835_v58 = vpack.c.bf16 %v1648_v54, %v1646_v51 }
 0x187   :  { %v4045_v62 = vpop.f32.mrb[10].mxu1  ;;  %2826 = vmatpush1.bf16.msra.mxu1 %v2825_v5  ;;  %2766 = vmatpush1.bf16.msra.mxu0 %v2765_v12 }
 0x188   :  { %v4047_v3 = vpop.f32.mrb[11].mxu1  ;;  %2828 = vmatprep.subr.bf16.mxu1 %v2827_v19  ;;  %2768 = vmatprep.subr.bf16.mxu0 %v2767_v31 }
 0x18b   :  { %v4049_v11 = vpop.f32.mrb[12].mxu1  ;;  %2830 = vmatpush1.bf16.msra.mxu1 %v2829_v9  ;;  %2770 = vmatpush1.bf16.msra.mxu0 %v2769_v35 }
 0x18c   :  { %v4051_v15 = vpop.f32.mrb[13].mxu1  ;;  %2832 = vmatprep.subr.bf16.mxu1 %v2831_v44 }
 0x18f   :  { %v4053_v33 = vpop.f32.mrb[14].mxu1  ;;  %2834 = vmatpush1.bf16.msra.mxu1 %v2833_v49 }
 0x190   :  { %v4055_v39 = vpop.f32.mrb[15].mxu1  ;;  %2836 = vmatprep.subr.bf16.mxu1 %v2835_v58 }
 0x193   :  { %v4057_v53 = vpop.f32.mrb[16].mxu1 }
 0x194   :  { %v4059_v57 = vpop.f32.mrb[17].mxu1 }
 0x197   :  { %v4061_v4 = vpop.f32.mrb[18].mxu1 }
 0x198   :  { %v4063_v7 = vpop.f32.mrb[19].mxu1 }
 0x19b   :  { %v4065_v20 = vpop.f32.mrb[20].mxu1 }
 0x19c   :  { %v4067_v25 = vpop.f32.mrb[21].mxu1 }
 0x19f   :  { %v4069_v42 = vpop.f32.mrb[22].mxu1 }
 0x1a0   :  { %v4071_v47 = vpop.f32.mrb[23].mxu1 }
 0x1a3   :  { %v4073_v55 = vpop.f32.mrb[24].mxu1 }
 0x1a4   :  { %v4075_v60 = vpop.f32.mrb[25].mxu1 }
 0x1a7   :  { %v4077_v13 = vpop.f32.mrb[26].mxu1 }
 0x1a8   :  { %v4079_v18 = vpop.f32.mrb[27].mxu1 }
 0x1ab   :  { %v4081_v36 = vpop.f32.mrb[28].mxu1 }
 0x1ac   :  { %v4083_v41 = vpop.f32.mrb[29].mxu1 }
 0x1af   :  { %v4085_v50 = vpop.f32.mrb[30].mxu1 }
 0x1b0   :  { %v4087_v56 = vpop.f32.mrb[31].mxu1 }
 0x1b3   :  { %v4089_v59 = vpop.f32.mrb[32].mxu1 }
 0x1b4   :  { %v4091_v61 = vpop.f32.mrb[33].mxu1 }
 0x1b7   :  { %v4093_v63 = vpop.f32.mrb[34].mxu1 }
 0x1b8   :  { %v4095_v1 = vpop.f32.mrb[35].mxu1 }
 0x1bb   :  { %v4097_v2 = vpop.f32.mrb[36].mxu1 }
 0x1bc   :  { %v4099_v5 = vpop.f32.mrb[37].mxu1 }
 0x1bf   :  { %v4101_v6 = vpop.f32.mrb[38].mxu1 }
 0x1c0   :  { %v4103_v8 = vpop.f32.mrb[39].mxu1 }
 0x1c3   :  { %v4105_v10 = vpop.f32.mrb[40].mxu1 }
 0x1c4   :  { %v4107_v12 = vpop.f32.mrb[41].mxu1 }
 0x1c7   :  { %v4109_v14 = vpop.f32.mrb[42].mxu1 }
 0x1c8   :  { %v4111_v16 = vpop.f32.mrb[43].mxu1 }
 0x1cb   :  { %v4113_v17 = vpop.f32.mrb[44].mxu1 }
 0x1cc   :  { %v4115_v19 = vpop.f32.mrb[45].mxu1 }
 0x1cf   :  { %v4117_v21 = vpop.f32.mrb[46].mxu1 }
 0x1d0   :  { %v4119_v22 = vpop.f32.mrb[47].mxu1 }
 0x1dc   :  { %v1259_v24 = vpop.f32.mrb[0].mxu0 }
 0x1dd   :  { %v2959_v9 = vadd.f32 %v1259_v24, %v3971_v26  ;;  %v1261_v31 = vpop.f32.mrb[1].mxu0 }
 0x1de   :  { %v2960_v32 = vadd.f32 %v1261_v31, %v3973_v27 }
 0x1e0   :  { %v1450_v34 = vmax.f32 %v2959_v9, %v2960_v32  ;;  %v1265_v35 = vpop.f32.mrb[2].mxu0 }
 0x1e1   :  { %v2961_v37 = vadd.f32 %v1265_v35, %v3978_v28  ;;  %v1267_v38 = vpop.f32.mrb[3].mxu0 }
 0x1e2   :  { %v2962_v44 = vadd.f32 %v1267_v38, %v3980_v29 }
 0x1e4   :  { %v1451_v45 = vmax.f32 %v2961_v37, %v2962_v44  ;;  %v1271_v46 = vpop.f32.mrb[4].mxu0 }
 0x1e5   :  { %v2963_v49 = vadd.f32 %v1271_v46, %v4033_v23  ;;  %v1273_v51 = vpop.f32.mrb[5].mxu0 }
 0x1e6   :  { %v2964_v54 = vadd.f32 %v1273_v51, %v4035_v30 }
 0x1e8   :  { %v1452_v58 = vmax.f32 %v2963_v49, %v2964_v54  ;;  %v1277_v0 = vpop.f32.mrb[6].mxu0 }
 0x1e9   :  { %v2965_v26 = vadd.f32 %v1277_v0, %v4037_v40  ;;  %v1279_v24 = vpop.f32.mrb[7].mxu0 }
 0x1ea   :  { %v2966_v27 = vadd.f32 %v1279_v24, %v4039_v43 }
 0x1ec   :  { %v1453_v9 = vmax.f32 %v2965_v26, %v2966_v27  ;;  %v1283_v31 = vpop.f32.mrb[8].mxu0 }
 0x1ed   :  { %v2967_v28 = vadd.f32 %v1283_v31, %v4041_v48  ;;  %v1285_v32 = vpop.f32.mrb[9].mxu0 }
 0x1ee   :  { %v2968_v29 = vadd.f32 %v1285_v32, %v4043_v52 }
 0x1f0   :  { %v1454_v35 = vmax.f32 %v2967_v28, %v2968_v29  ;;  %v1289_v37 = vpop.f32.mrb[10].mxu0 }
 0x1f1   :  { %v2969_v23 = vadd.f32 %v1289_v37, %v4045_v62  ;;  %v1291_v38 = vpop.f32.mrb[11].mxu0 }
 0x1f2   :  { %v2970_v30 = vadd.f32 %v1291_v38, %v4047_v3 }
 0x1f4   :  { %v1455_v44 = vmax.f32 %v2969_v23, %v2970_v30  ;;  %v1295_v46 = vpop.f32.mrb[12].mxu0 }
 0x1f5   :  { %v2971_v0 = vadd.f32 %v1295_v46, %v4049_v11  ;;  %v1297_v40 = vpop.f32.mrb[13].mxu0 }
 0x1f6   :  { %v2972_v43 = vadd.f32 %v1297_v40, %v4051_v15 }
 0x1f8   :  { %v1456_v49 = vmax.f32 %v2971_v0, %v2972_v43  ;;  %v1301_v51 = vpop.f32.mrb[14].mxu0 }
 0x1f9   :  { %v2973_v48 = vadd.f32 %v1301_v51, %v4053_v33  ;;  %v1303_v54 = vpop.f32.mrb[15].mxu0 }
 0x1fa   :  { %v4136_v52 = vmax.f32 %v1450_v34, %v1456_v49  ;;  %v2974_v26 = vadd.f32 %v1303_v54, %v4055_v39 }
 0x1fc   :  { %v1457_v62 = vmax.f32 %v2973_v48, %v2974_v26  ;;  %v1307_v24 = vpop.f32.mrb[16].mxu0 }
 0x1fd   :  { %v2975_v3 = vadd.f32 %v1307_v24, %v4057_v53  ;;  %v1309_v27 = vpop.f32.mrb[17].mxu0 }
 0x1fe   :  { %v4140_v31 = vmax.f32 %v1451_v45, %v1457_v62  ;;  %v2976_v11 = vadd.f32 %v1309_v27, %v4059_v57 }
 0x200   :  { %v1458_v28 = vmax.f32 %v2975_v3, %v2976_v11  ;;  %v1313_v15 = vpop.f32.mrb[18].mxu0 }
 0x201   :  { %v2977_v32 = vadd.f32 %v1313_v15, %v4061_v4  ;;  %v1315_v29 = vpop.f32.mrb[19].mxu0 }
 0x202   :  { %v4144_v33 = vmax.f32 %v1452_v58, %v1458_v28  ;;  %v2978_v34 = vadd.f32 %v1315_v29, %v4063_v7 }
 0x204   :  { %v1459_v37 = vmax.f32 %v2977_v32, %v2978_v34  ;;  %v1319_v39 = vpop.f32.mrb[20].mxu0 }
 0x205   :  { %v2979_v23 = vadd.f32 %v1319_v39, %v4065_v20  ;;  %v1321_v38 = vpop.f32.mrb[21].mxu0  ;;  %v4192_v39 = vld [vmem:[%s4312_s2] ss:$0 sm:$0xff] }
 0x206   :  { %v4148_v53 = vmax.f32 %v1453_v9, %v1459_v37  ;;  %v2980_v45 = vadd.f32 %v1321_v38, %v4067_v25 }
 0x208   :  { %v1460_v30 = vmax.f32 %v2979_v23, %v2980_v45  ;;  %v1325_v57 = vpop.f32.mrb[22].mxu0 }
 0x209   :  { %v2981_v46 = vadd.f32 %v1325_v57, %v4069_v42  ;;  %v1327_v0 = vpop.f32.mrb[23].mxu0  ;;  %v1475_v57 = vadd.f32 %v4192_v39, %v4136_v52 }
 0x20a   :  { %v4152_v4 = vmax.f32 %v1454_v35, %v1460_v30  ;;  %v2982_v58 = vadd.f32 %v1327_v0, %v4071_v47 }
 0x20c   :  { %v1461_v40 = vmax.f32 %v2981_v46, %v2982_v58  ;;  %v1331_v7 = vpop.f32.mrb[24].mxu0 }
 0x20d   :  { %v2983_v43 = vadd.f32 %v1331_v7, %v4073_v55  ;;  %v1333_v49 = vpop.f32.mrb[25].mxu0 }
 0x20e   :  { %v4156_v20 = vmax.f32 %v1455_v44, %v1461_v40  ;;  %v2984_v9 = vadd.f32 %v1333_v49, %v4075_v60  ;;  %v1645_v49 = vld [vmem:[#allocation2 + $0x400] sm:$0xff] }
 0x210   :  { %v1487_v51 = vmax.f32 %v2983_v43, %v2984_v9  ;;  %v1337_v25 = vpop.f32.mrb[26].mxu0  ;;  %v1481_v43 = vmax.f32 %v1475_v57, 0.0  ;;  %v1647_v9 = vld [vmem:[#allocation2 + $0x410] sm:$0xff] }
 0x211   :  { %v2985_v48 = vadd.f32 %v1337_v25, %v4077_v13  ;;  %v1339_v54 = vpop.f32.mrb[27].mxu0 }
 0x212   :  { %v2986_v42 = vadd.f32 %v1339_v54, %v4079_v18 }
 0x214   :  { %v1488_v35 = vmax.f32 %v2985_v48, %v2986_v42  ;;  %v1343_v26 = vpop.f32.mrb[28].mxu0  ;;  %v1652_v48 = vld [vmem:[#allocation2 + $0x438] sm:$0xff] }
 0x215   :  { %v2987_v47 = vadd.f32 %v1343_v26, %v4081_v36  ;;  %v1345_v62 = vpop.f32.mrb[29].mxu0  ;;  %v2837_v26 = vpack.c.bf16 %v1647_v9, %v1645_v49 }
 0x216   :  { %v2988_v24 = vadd.f32 %v1345_v62, %v4083_v41 }
 0x218   :  { %v1489_v55 = vmax.f32 %v2987_v47, %v2988_v24  ;;  %v1349_v3 = vpop.f32.mrb[30].mxu0  ;;  %v1477_v47 = vadd.f32 %v4192_v39, %v4144_v33 }
 0x219   :  { %v4164_v44 = vadd.f32 %v1349_v3, %v4085_v50  ;;  %v1351_v60 = vpop.f32.mrb[31].mxu0  ;;  %v1649_v3 = vld [vmem:[#allocation2 + $0x420] sm:$0xff] }
 0x21a   :  { %v4167_v27 = vadd.f32 %v1351_v60, %v4087_v56  ;;  %v1651_v60 = vld [vmem:[#allocation2 + $0x430] sm:$0xff] }
 0x21c   :  { %v1490_v13 = vmax.f32 %v4164_v44, %v4167_v27  ;;  %v1355_v18 = vpop.f32.mrb[32].mxu0  ;;  %v1660_v44 = vld [vmem:[#allocation2 + $0x478] sm:$0xff] }
 0x21d   :  { %v4172_v11 = vadd.f32 %v1355_v18, %v4089_v59  ;;  %v1357_v36 = vpop.f32.mrb[33].mxu0 }
 0x21e   :  { %v4175_v28 = vadd.f32 %v1357_v36, %v4091_v61 }
 0x220   :  { %v1491_v41 = vmax.f32 %v4172_v11, %v4175_v28  ;;  %v1361_v50 = vpop.f32.mrb[34].mxu0  ;;  %v1657_v11 = vld [vmem:[#allocation2 + $0x460] sm:$0xff]  ;;  %v1659_v28 = vld [vmem:[#allocation2 + $0x470] sm:$0xff] }
 0x221   :  { %v4180_v15 = vadd.f32 %v1361_v50, %v4093_v63  ;;  %v1363_v56 = vpop.f32.mrb[35].mxu0  ;;  %v2849_v49 = vpack.c.bf16 %v1659_v28, %v1657_v11  ;;  %v2069_v28 = vld [vmem:[#allocation4 + $0xd0] sm:$0xff] }
 0x222   :  { %v4183_v32 = vadd.f32 %v1363_v56, %v4095_v1 }
 0x224   :  { %v1492_v29 = vmax.f32 %v4180_v15, %v4183_v32  ;;  %v1367_v59 = vpop.f32.mrb[36].mxu0  ;;  %v1668_v15 = vld [vmem:[#allocation2 + $0x4b8] sm:$0xff] }
 0x225   :  { %v2995_v34 = vadd.f32 %v1367_v59, %v4097_v2  ;;  %v1369_v37 = vpop.f32.mrb[37].mxu0 }
 0x226   :  { %v2996_v61 = vadd.f32 %v1369_v37, %v4099_v5  ;;  %v2841_v37 = vpack.c.bf16 %v1651_v60, %v1649_v3  ;;  %v1673_v60 = vld [vmem:[#allocation2 + $0x4e0] sm:$0xff] }
 0x228   :  { %v1493_v63 = vmax.f32 %v2995_v34, %v2996_v61  ;;  %v1373_v23 = vpop.f32.mrb[38].mxu0  ;;  %v4225_v61 = vmax.f32 %v1477_v47, 0.0  ;;  %v1676_v47 = vld [vmem:[#allocation2 + $0x4f8] sm:$0xff] }
 0x229   :  { %v2997_v38 = vadd.f32 %v1373_v23, %v4101_v6  ;;  %v1375_v1 = vpop.f32.mrb[39].mxu0  ;;  %v1653_v23 = vld [vmem:[#allocation2 + $0x440] sm:$0xff] }
 0x22a   :  { %v1499_v45 = vmax.f32 %v1487_v51, %v1493_v63  ;;  %v2998_v30 = vadd.f32 %v1375_v1, %v4103_v8  ;;  %v1476_v8 = vadd.f32 %v4192_v39, %v4140_v31  ;;  %v1478_v63 = vadd.f32 %v4192_v39, %v4148_v53 }
 0x22c   :  { %v1494_v2 = vmax.f32 %v2997_v38, %v2998_v30  ;;  %v1379_v46 = vpop.f32.mrb[40].mxu0  ;;  %v4199_v5 = vadd.f32 %v4192_v39, %v1499_v45  ;;  %v1482_v62 = vmax.f32 %v1476_v8, 0.0  ;;  %v1655_v38 = vld [vmem:[#allocation2 + $0x450] sm:$0xff] }
 0x22d   :  { %v2999_v0 = vadd.f32 %v1379_v46, %v4105_v10  ;;  %v1381_v58 = vpop.f32.mrb[41].mxu0  ;;  %v1650_v10 = vld [vmem:[#allocation2 + $0x428] sm:$0xff]  ;;  %v2845_v46 = vpack.c.bf16 %v1655_v38, %v1653_v23  ;;  %v2046_v23 = vld [vmem:[#allocation4 + $0x18] sm:$0xff]  ;;  %v2063_v38 = vld [vmem:[#allocation4 + $0xa0] sm:$0xff] }
 0x22e   :  { %v1500_v40 = vmax.f32 %v1488_v35, %v1494_v2  ;;  %v3000_v7 = vadd.f32 %v1381_v58, %v4107_v12  ;;  %v1511_v6 = vmax.f32 %v4199_v5, 0.0  ;;  %v2839_v24 = vpack.c.bf16 %v1652_v48, %v1650_v10  ;;  %v1665_v10 = vld [vmem:[#allocation2 + $0x4a0] sm:$0xff]  ;;  %v1667_v48 = vld [vmem:[#allocation2 + $0x4b0] sm:$0xff]  ;;  %v1672_v5 = vld [vmem:[#allocation2 + $0x4d8] sm:$0xff] }
 0x230   :  { %v1506_v52 = vadd.f32 %v4192_v39, %v1500_v40  ;;  %v1495_v51 = vmax.f32 %v2999_v0, %v3000_v7  ;;  %v1385_v25 = vpop.f32.mrb[42].mxu0  ;;  %1741 = vmatprep.mubr.f32.mxu0 %v1511_v6  ;;  %v4241_v0 = vmax.f32 %v1478_v63, 0.0 }
 0x231   :  { %v3001_v54 = vadd.f32 %v1385_v25, %v4109_v14  ;;  %v1387_v12 = vpop.f32.mrb[43].mxu0  ;;  %1742 = vmatmul.mubr.f32.vlgmr.msra.gmra.mrb[48].mxu0 %v1481_v43  ;;  %v1654_v14 = vld [vmem:[#allocation2 + $0x448] sm:$0xff] }
 0x232   :  { %v4210_v42 = vmax.f32 %v1506_v52, 0.0  ;;  %v1501_v35 = vmax.f32 %v1489_v55, %v1495_v51  ;;  %v3002_v31 = vadd.f32 %v1387_v12, %v4111_v16  ;;  %v1656_v55 = vld [vmem:[#allocation2 + $0x458] sm:$0xff]  ;;  %v1661_v52 = vld [vmem:[#allocation2 + $0x480] sm:$0xff]  ;;  %v1663_v51 = vld [vmem:[#allocation2 + $0x490] sm:$0xff] }
 0x233   :  { %v1666_v25 = vld [vmem:[#allocation2 + $0x4a8] sm:$0xff]  ;;  %v2853_v32 = vpack.c.bf16 %v1663_v51, %v1661_v52  ;;  %v2055_v51 = vld [vmem:[#allocation4 + $0x60] sm:$0xff] }
 0x234   :  { %v1507_v18 = vadd.f32 %v4192_v39, %v1501_v35  ;;  %v1496_v36 = vmax.f32 %v3001_v54, %v3002_v31  ;;  %v1391_v50 = vpop.f32.mrb[44].mxu0  ;;  %1747 = vmatprep.mubr.f32.mxu0 %v4210_v42  ;;  %1854 = vmatprep.mubr.f32.mxu1 %v4210_v42  ;;  %v1670_v54 = vld [vmem:[#allocation2 + $0x4c8] sm:$0xff]  ;;  %v1480_v35 = vadd.f32 %v4192_v39, %v4156_v20  ;;  %v1669_v31 = vld [vmem:[#allocation2 + $0x4c0] sm:$0xff] }
 0x235   :  { %v3003_v16 = vadd.f32 %v1391_v50, %v4113_v17  ;;  %v1393_v56 = vpop.f32.mrb[45].mxu0  ;;  %1748 = vmatmul.mubr.f32.gmra.mrb[50].mxu0 %v1482_v62  ;;  %1855 = vmatmul.mubr.f32.vlgmr.msra.gmra.mrb[48].mxu1 %v1482_v62  ;;  %v2843_v17 = vpack.c.bf16 %v1656_v55, %v1654_v14  ;;  %v2859_v12 = vpack.c.bf16 %v1672_v5, %v1670_v54  ;;  %v2059_v55 = vld [vmem:[#allocation4 + $0x80] sm:$0xff]  ;;  %v2058_v54 = vld [vmem:[#allocation4 + $0x78] sm:$0xff] }
 0x236   :  { %v4219_v33 = vmax.f32 %v1507_v18, 0.0  ;;  %v1502_v59 = vmax.f32 %v1490_v13, %v1496_v36  ;;  %v3004_v34 = vadd.f32 %v1393_v56, %v4115_v19  ;;  %2838 = vmatpush1.bf16.msra.mxu1 %v2837_v26  ;;  %v1658_v19 = vld [vmem:[#allocation2 + $0x468] sm:$0xff]  ;;  %v1671_v26 = vld [vmem:[#allocation2 + $0x4d0] sm:$0xff]  ;;  %v4324_v36 = vmov 0.0  }
 0x237   :  { %2840 = vmatprep.subr.bf16.mxu1 %v2839_v24  ;;  %v2847_v58 = vpack.c.bf16 %v1660_v44, %v1658_v19  ;;  %v1486_v24 = vmax.f32 %v1480_v35, 0.0  ;;  %v1675_v18 = vld [vmem:[#allocation2 + $0x4f0] sm:$0xff]  ;;  %v2048_v19 = vld [vmem:[#allocation4 + $0x28] sm:$0xff] }
 0x238   :  { %v1508_v1 = vadd.f32 %v4192_v39, %v1502_v59  ;;  %v1497_v45 = vmax.f32 %v3003_v16, %v3004_v34  ;;  %v1397_v30 = vpop.f32.mrb[46].mxu0  ;;  %1753 = vmatprep.mubr.f32.mxu0 %v4219_v33  ;;  %1860 = vmatprep.mubr.f32.mxu1 %v4219_v33  ;;  %v2865_v20 = vpack.c.bf16 %v1675_v18, %v1673_v60  ;;  %v2060_v16 = vld [vmem:[#allocation4 + $0x88] sm:$0xff]  ;;  %v2043_v59 = vld [vmem:[#allocation4] sm:$0xff] }
 0x239   :  { %v3005_v27 = vadd.f32 %v1397_v30, %v4117_v21  ;;  %v1399_v13 = vpop.f32.mrb[47].mxu0  ;;  %1754 = vmatmul.mubr.f32.gmra.mrb[52].mxu0 %v4225_v61  ;;  %1861 = vmatmul.mubr.f32.gmra.mrb[50].mxu1 %v4225_v61  ;;  %v1479_v21 = vadd.f32 %v4192_v39, %v4152_v4  ;;  %v2867_v56 = vpack.c.bf16 %v2060_v16, %v2059_v55  ;;  %v2047_v30 = vld [vmem:[#allocation4 + $0x20] sm:$0xff] }
 0x23a   :  { %v4235_v53 = vmax.f32 %v1508_v1, 0.0  ;;  %v1503_v57 = vmax.f32 %v1491_v41, %v1497_v45  ;;  %v3006_v2 = vadd.f32 %v1399_v13, %v4119_v22  ;;  %2842 = vmatpush1.bf16.msra.mxu1 %v2841_v37  ;;  %v1662_v22 = vld [vmem:[#allocation2 + $0x488] sm:$0xff]  ;;  %v1664_v41 = vld [vmem:[#allocation2 + $0x498] sm:$0xff]  ;;  %v2061_v37 = vld [vmem:[#allocation4 + $0x90] sm:$0xff]  ;;  %v2877_v44 = vpack.c.bf16 %v2048_v19, %v2047_v30 }
 0x23b   :  { %2844 = vmatprep.subr.bf16.mxu1 %v2843_v17  ;;  %v1485_v8 = vmax.f32 %v1479_v21, 0.0  ;;  %v2851_v9 = vpack.c.bf16 %v1664_v41, %v1662_v22  ;;  %v2045_v17 = vld [vmem:[#allocation4 + $0x10] sm:$0xff]  ;;  %v2064_v1 = vld [vmem:[#allocation4 + $0xa8] sm:$0xff]  ;;  %v2066_v13 = vld [vmem:[#allocation4 + $0xb8] sm:$0xff] }
 0x23c   :  { %v1498_v40 = vmax.f32 %v3005_v27, %v3006_v2  ;;  %1759 = vmatprep.mubr.f32.mxu0 %v4235_v53  ;;  %1866 = vmatprep.mubr.f32.mxu1 %v4235_v53  ;;  %v1509_v7 = vadd.f32 %v4192_v39, %v1503_v57  ;;  %v2875_v45 = vpack.c.bf16 %v2064_v1, %v2063_v38  ;;  %v2065_v27 = vld [vmem:[#allocation4 + $0xb0] sm:$0xff]  ;;  %v2050_v2 = vld [vmem:[#allocation4 + $0x38] sm:$0xff]  ;;  %v2068_v21 = vld [vmem:[#allocation4 + $0xc8] sm:$0xff] }
 0x23d   :  { %1760 = vmatmul.mubr.f32.gmra.mrb[54].mxu0 %v4241_v0  ;;  %1867 = vmatmul.mubr.f32.gmra.mrb[52].mxu1 %v4241_v0  ;;  %v2049_v57 = vld [vmem:[#allocation4 + $0x30] sm:$0xff]  ;;  %v2070_v22 = vld [vmem:[#allocation4 + $0xd8] sm:$0xff] }
 0x23e   :  { %v4253_v4 = vmax.f32 %v1492_v29, %v1498_v40  ;;  %1765 = vmatprep.mubr.f32.mxu0 %v1482_v62  ;;  %2846 = vmatpush1.bf16.msra.mxu1 %v2845_v46  ;;  %v4255_v43 = vmax.f32 %v1509_v7, 0.0  ;;  %v2855_v29 = vpack.c.bf16 %v1668_v15, %v1666_v25  ;;  %v2861_v62 = vpack.c.bf16 %v1671_v26, %v1669_v31  ;;  %v2051_v40 = vld [vmem:[#allocation4 + $0x40] sm:$0xff]  ;;  %v2052_v7 = vld [vmem:[#allocation4 + $0x48] sm:$0xff] }
 0x23f   :  { %2848 = vmatprep.subr.bf16.mxu1 %v2847_v58  ;;  %v2881_v46 = vpack.c.bf16 %v2050_v2, %v2049_v57  ;;  %v2885_v11 = vpack.c.bf16 %v2052_v7, %v2051_v40  ;;  %v2887_v41 = vpack.c.bf16 %v2070_v22, %v2069_v28  ;;  %v2056_v25 = vld [vmem:[#allocation4 + $0x68] sm:$0xff] }
 0x240   :  { %1872 = vmatprep.mubr.f32.mxu1 %v4255_v43  ;;  %v1510_v50 = vadd.f32 %v4192_v39, %v4253_v4  ;;  %v2873_v39 = vpack.c.bf16 %v2046_v23, %v2045_v17  ;;  %v2053_v4 = vld [vmem:[#allocation4 + $0x50] sm:$0xff]  ;;  %v2893_v15 = vpack.c.bf16 %v2056_v25, %v2055_v51 }
 0x241   :  { %1766 = vmatmul.mubr.f32.gmra.mrb[56].mxu0 %v1511_v6  ;;  %1873 = vmatmul.mubr.f32.gmra.mrb[54].mxu1 %v1485_v8  ;;  %v2857_v6 = vpack.c.bf16 %v1667_v48, %v1665_v10  ;;  %v2057_v48 = vld [vmem:[#allocation4 + $0x70] sm:$0xff] }
 0x242   :  { %1771 = vmatprep.mubr.f32.mxu0 %v4225_v61  ;;  %1878 = vmatprep.mubr.f32.mxu1 %v4225_v61  ;;  %v1516_v14 = vmax.f32 %v1510_v50, 0.0  ;;  %v2897_v5 = vpack.c.bf16 %v2058_v54, %v2057_v48 }
 0x243   :  { %2850 = vmatpush1.bf16.msra.mxu1 %v2849_v49  ;;  %v2071_v49 = vld [vmem:[#allocation4 + $0xe0] sm:$0xff] }
 0x244   :  { %2852 = vmatprep.subr.bf16.mxu1 %v2851_v9  ;;  %v2072_v9 = vld [vmem:[#allocation4 + $0xe8] sm:$0xff] }
 0x245   :  { %1772 = vmatmul.mubr.f32.gmra.mrb[58].mxu0 %v4210_v42  ;;  %1879 = vmatmul.mubr.f32.gmra.mrb[56].mxu1 %v4210_v42  ;;  %v1674_v42 = vld [vmem:[#allocation2 + $0x4e8] sm:$0xff]  ;;  %v2891_v52 = vpack.c.bf16 %v2072_v9, %v2071_v49 }
 0x246   :  { %1777 = vmatprep.mubr.f32.mxu0 %v4241_v0  ;;  %1884 = vmatprep.mubr.f32.mxu1 %v4241_v0  ;;  %v2863_v3 = vpack.c.bf16 %v1676_v47, %v1674_v42 }
 0x247   :  { %2854 = vmatpush1.bf16.msra.mxu1 %v2853_v32  ;;  %v2073_v32 = vld [vmem:[#allocation4 + $0xf0] sm:$0xff] }
 0x248   :  { %2856 = vmatprep.subr.bf16.mxu1 %v2855_v29  ;;  %v2074_v29 = vld [vmem:[#allocation4 + $0xf8] sm:$0xff] }
 0x249   :  { %1778 = vmatmul.mubr.f32.gmra.mrb[60].mxu0 %v4219_v33  ;;  %1885 = vmatmul.mubr.f32.gmra.mrb[58].mxu1 %v4219_v33  ;;  %v2895_v10 = vpack.c.bf16 %v2074_v29, %v2073_v32  ;;  %v2075_v32 = vld [vmem:[#allocation4 + $0x100] sm:$0xff]  ;;  %v2076_v29 = vld [vmem:[#allocation4 + $0x108] sm:$0xff] }
 0x24a   :  { %1783 = vmatprep.mubr.f32.mxu0 %v1485_v8  ;;  %1890 = vmatprep.mubr.f32.mxu1 %v1485_v8 }
 0x24b   :  { %2858 = vmatpush1.bf16.msra.mxu1 %v2857_v6  ;;  %v2091_v6 = vld [vmem:[#allocation4 + $0x180] sm:$0xff] }
 0x24c   :  { %2860 = vmatprep.subr.bf16.mxu1 %v2859_v12  ;;  %v2092_v12 = vld [vmem:[#allocation4 + $0x188] sm:$0xff] }
 0x24d   :  { %1784 = vmatmul.mubr.f32.gmra.mrb[62].mxu0 %v4235_v53  ;;  %1891 = vmatmul.mubr.f32.gmra.mrb[60].mxu1 %v4235_v53  ;;  %v2899_v35 = vpack.c.bf16 %v2092_v12, %v2091_v6  ;;  %v2094_v6 = vld [vmem:[#allocation4 + $0x198] sm:$0xff] }
 0x24e   :  { %1896 = vmatprep.mubr.f32.mxu1 %v1486_v24 }
 0x24f   :  { %2862 = vmatpush1.bf16.msra.mxu1 %v2861_v62 }
 0x250   :  { %2864 = vmatprep.subr.bf16.mxu1 %v2863_v3 }
 0x251   :  { %1897 = vmatmul.mubr.f32.gmra.mrb[62].mxu1 %v4255_v43 }
 0x252   :  { %1967 = vmatprep.mubr.f32.mxu1 %v4324_v36 }
 0x253   :  { %2866 = vmatpush1.bf16.msra.mxu1 %v2865_v20 }
 0x254   :  { %2868 = vmatprep.subr.bf16.mxu1 %v2867_v56 }
 0x256   :  { %1968 = vmatmul.mubr.f32.vlgmr.msra.gmra.mrb[48].mxu1 %v4225_v61  ;;  %v2062_v61 = vld [vmem:[#allocation4 + $0x98] sm:$0xff] }
 0x257   :  { %1973 = vmatprep.mubr.f32.mxu1 %v4324_v36  ;;  %v2871_v63 = vpack.c.bf16 %v2062_v61, %v2061_v37 }
 0x25a   :  { %1974 = vmatmul.mubr.f32.gmra.mrb[50].mxu1 %v4241_v0  ;;  %v2067_v0 = vld [vmem:[#allocation4 + $0xc0] sm:$0xff] }
 0x25b   :  { %1979 = vmatprep.mubr.f32.mxu1 %v4324_v36  ;;  %v2883_v58 = vpack.c.bf16 %v2068_v21, %v2067_v0 }
 0x25e   :  { %1980 = vmatmul.mubr.f32.gmra.mrb[52].mxu1 %v1485_v8 }
 0x25f   :  { %1985 = vmatprep.mubr.f32.mxu1 %v4324_v36 }
 0x262   :  { %1986 = vmatmul.mubr.f32.gmra.mrb[54].mxu1 %v1486_v24 }
 0x263   :  { %1991 = vmatprep.mubr.f32.mxu1 %v4324_v36 }
 0x266   :  { %1992 = vmatmul.mubr.f32.gmra.mrb[56].mxu1 %v4219_v33  ;;  %v2044_v33 = vld [vmem:[#allocation4 + $0x8] sm:$0xff] }
 0x267   :  { %1997 = vmatprep.mubr.f32.mxu1 %v4324_v36  ;;  %v2869_v34 = vpack.c.bf16 %v2044_v33, %v2043_v59 }
 0x269   :  { %2870 = vmatpush3.bf16.msra.mxu1 %v2869_v34 }
 0x26a   :  { %1998 = vmatmul.mubr.f32.gmra.mrb[58].mxu1 %v4235_v53  ;;  %2872 = vmatprep.subr.bf16.mxu1 %v2871_v63  ;;  %v2879_v53 = vpack.c.bf16 %v2066_v13, %v2065_v27 }
 0x26b   :  { %2003 = vmatprep.mubr.f32.mxu1 %v4324_v36 }
 0x26d   :  { %2874 = vmatpush3.bf16.msra.mxu1 %v2873_v39 }
 0x26e   :  { %2004 = vmatmul.mubr.f32.gmra.mrb[60].mxu1 %v4255_v43  ;;  %2876 = vmatprep.subr.bf16.mxu1 %v2875_v45  ;;  %v2054_v43 = vld [vmem:[#allocation4 + $0x58] sm:$0xff] }
 0x26f   :  { %2009 = vmatprep.mubr.f32.mxu1 %v4324_v36  ;;  %v2889_v8 = vpack.c.bf16 %v2054_v43, %v2053_v4  ;;  %v4291_v43 = vld [vmem:[%s4314_s4] ss:$0 sm:$0xff] }
 0x271   :  { %2878 = vmatpush3.bf16.msra.mxu1 %v2877_v44 }
 0x272   :  { %2010 = vmatmul.mubr.f32.gmra.mrb[62].mxu1 %v1516_v14  ;;  %2880 = vmatprep.subr.bf16.mxu1 %v2879_v53 }
 0x275   :  { %2882 = vmatpush3.bf16.msra.mxu1 %v2881_v46 }
 0x276   :  { %2884 = vmatprep.subr.bf16.mxu1 %v2883_v58 }
 0x279   :  { %2886 = vmatpush3.bf16.msra.mxu1 %v2885_v11 }
 0x27a   :  { %2888 = vmatprep.subr.bf16.mxu1 %v2887_v41 }
 0x27d   :  { %2890 = vmatpush3.bf16.msra.mxu1 %v2889_v8 }
 0x27e   :  { %2892 = vmatprep.subr.bf16.mxu1 %v2891_v52 }
 0x281   :  { %2894 = vmatpush3.bf16.msra.mxu1 %v2893_v15 }
 0x282   :  { %2896 = vmatprep.subr.bf16.mxu1 %v2895_v10 }
 0x285   :  { %2898 = vmatpush3.bf16.msra.mxu1 %v2897_v5  ;;  %v2093_v5 = vld [vmem:[#allocation4 + $0x190] sm:$0xff] }
 0x286   :  { %2900 = vmatprep.subr.bf16.mxu1 %v2899_v35 }
 0x304   :  { %v1743_v31 = vpop.f32.mrb[48].mxu0 }
 0x305   :  { %v1745_v26 = vpop.f32.mrb[49].mxu0 }
 0x308   :  { %v1749_v42 = vpop.f32.mrb[50].mxu0 }
 0x309   :  { %v1751_v47 = vpop.f32.mrb[51].mxu0 }
 0x30c   :  { %v1755_v62 = vpop.f32.mrb[52].mxu0 }
 0x30d   :  { %v1757_v24 = vpop.f32.mrb[53].mxu0 }
 0x310   :  { %v1761_v3 = vpop.f32.mrb[54].mxu0 }
 0x311   :  { %v1763_v60 = vpop.f32.mrb[55].mxu0 }
 0x314   :  { %v1767_v18 = vpop.f32.mrb[56].mxu0 }
 0x315   :  { %v1769_v20 = vpop.f32.mrb[57].mxu0 }
 0x318   :  { %v1773_v50 = vpop.f32.mrb[58].mxu0 }
 0x319   :  { %v1775_v14 = vpop.f32.mrb[59].mxu0 }
 0x31c   :  { %v1779_v55 = vpop.f32.mrb[60].mxu0 }
 0x31d   :  { %v1781_v16 = vpop.f32.mrb[61].mxu0 }
 0x320   :  { %v1785_v56 = vpop.f32.mrb[62].mxu0 }
 0x321   :  { %v1787_v59 = vpop.f32.mrb[63].mxu0 }
 0x329   :  { %v1969_v33 = vpop.f32.mrb[48].mxu1 }
 0x32a   :  { %v3007_v34 = vadd.f32 %v1969_v33, %v1743_v31  ;;  %v1971_v37 = vpop.f32.mrb[49].mxu1  ;;  %v2080_v33 = vld [vmem:[#allocation4 + $0x128] sm:$0xff] }
 0x32b   :  { %v3008_v61 = vadd.f32 %v1971_v37, %v1745_v26  ;;  %v2098_v37 = vld [vmem:[#allocation4 + $0x1b8] sm:$0xff] }
 0x32d   :  { %v2016_v63 = vmax.f32 %v3007_v34, %v3008_v61  ;;  %v1975_v17 = vpop.f32.mrb[50].mxu1  ;;  %v2097_v34 = vld [vmem:[#allocation4 + $0x1b0] sm:$0xff] }
 0x32e   :  { %v3009_v23 = vadd.f32 %v1975_v17, %v1749_v42  ;;  %v1977_v39 = vpop.f32.mrb[51].mxu1  ;;  %v2911_v17 = vpack.c.bf16 %v2098_v37, %v2097_v34 }
 0x32f   :  { %v3010_v38 = vadd.f32 %v1977_v39, %v1751_v47  ;;  %v2901_v47 = vpack.c.bf16 %v2076_v29, %v2075_v32  ;;  %v2082_v39 = vld [vmem:[#allocation4 + $0x138] sm:$0xff]  ;;  %v2257_v32 = vld [vmem:[#allocation6 + $0x10] sm:$0xff]  ;;  %v3277_v29 = vmov 0.0|0.0  }
 0x331   :  { %v2017_v1 = vmax.f32 %v3009_v23, %v3010_v38  ;;  %v1981_v45 = vpop.f32.mrb[52].mxu1  ;;  %v2081_v23 = vld [vmem:[#allocation4 + $0x130] sm:$0xff]  ;;  %v2099_v38 = vld [vmem:[#allocation4 + $0x1c0] sm:$0xff] }
 0x332   :  { %v3011_v30 = vadd.f32 %v1981_v45, %v1755_v62  ;;  %v1983_v19 = vpop.f32.mrb[53].mxu1  ;;  %v2913_v45 = vpack.c.bf16 %v2082_v39, %v2081_v23  ;;  %v2348_v39 = vlaneseq }
 0x333   :  { %v3012_v44 = vadd.f32 %v1983_v19, %v1757_v24  ;;  %v2903_v24 = vpack.c.bf16 %v2094_v6, %v2093_v5  ;;  %v2083_v19 = vld [vmem:[#allocation4 + $0x140] sm:$0xff]  ;;  %v2260_v6 = vld [vmem:[#allocation6 + $0x28] sm:$0xff] }
 0x334   :  { %v2259_v5 = vld [vmem:[#allocation6 + $0x20] sm:$0xff] }
 0x335   :  { %v2018_v27 = vmax.f32 %v3011_v30, %v3012_v44  ;;  %v1987_v13 = vpop.f32.mrb[54].mxu1  ;;  %v2084_v44 = vld [vmem:[#allocation4 + $0x148] sm:$0xff] }
 0x336   :  { %v3013_v53 = vadd.f32 %v1987_v13, %v1761_v3  ;;  %v1989_v57 = vpop.f32.mrb[55].mxu1  ;;  %v2077_v3 = vld [vmem:[#allocation4 + $0x110] sm:$0xff]  ;;  %v2102_v13 = vld [vmem:[#allocation4 + $0x1d8] sm:$0xff] }
 0x337   :  { %v3014_v2 = vadd.f32 %v1989_v57, %v1763_v60  ;;  %v2078_v60 = vld [vmem:[#allocation4 + $0x118] sm:$0xff] }
 0x339   :  { %v2019_v46 = vmax.f32 %v3013_v53, %v3014_v2  ;;  %v1993_v0 = vpop.f32.mrb[56].mxu1  ;;  %v2917_v53 = vpack.c.bf16 %v2084_v44, %v2083_v19  ;;  %v2085_v2 = vld [vmem:[#allocation4 + $0x150] sm:$0xff] }
 0x33a   :  { %v3015_v21 = vadd.f32 %v1993_v0, %v1767_v18  ;;  %v1995_v58 = vpop.f32.mrb[57].mxu1  ;;  %v2103_v0 = vld [vmem:[#allocation4 + $0x1e0] sm:$0xff] }
 0x33b   :  { %v3016_v40 = vadd.f32 %v1995_v58, %v1769_v20  ;;  %v2095_v20 = vld [vmem:[#allocation4 + $0x1a0] sm:$0xff] }
 0x33d   :  { %v2020_v7 = vmax.f32 %v3015_v21, %v3016_v40  ;;  %v1999_v11 = vpop.f32.mrb[58].mxu1  ;;  %v2104_v21 = vld [vmem:[#allocation4 + $0x1e8] sm:$0xff] }
 0x33e   :  { %v3017_v28 = vadd.f32 %v1999_v11, %v1773_v50  ;;  %v2001_v22 = vpop.f32.mrb[59].mxu1  ;;  %v2096_v50 = vld [vmem:[#allocation4 + $0x1a8] sm:$0xff]  ;;  %v2923_v40 = vpack.c.bf16 %v2104_v21, %v2103_v0 }
 0x33f   :  { %v2024_v41 = vmax.f32 %v2016_v63, %v2020_v7  ;;  %v3018_v4 = vadd.f32 %v2001_v22, %v1775_v14  ;;  %v2087_v7 = vld [vmem:[#allocation4 + $0x160] sm:$0xff]  ;;  %v2088_v11 = vld [vmem:[#allocation4 + $0x168] sm:$0xff]  ;;  %v2106_v22 = vld [vmem:[#allocation4 + $0x1f8] sm:$0xff] }
 0x341   :  { %v2021_v8 = vmax.f32 %v3017_v28, %v3018_v4  ;;  %v2005_v49 = vpop.f32.mrb[60].mxu1  ;;  %v2035_v15 = vadd.f32 %v4291_v43, %v2024_v41  ;;  %v2105_v28 = vld [vmem:[#allocation4 + $0x1f0] sm:$0xff]  ;;  %v2925_v41 = vpack.c.bf16 %v2088_v11, %v2087_v7 }
 0x342   :  { %v3019_v9 = vadd.f32 %v2005_v49, %v1779_v55  ;;  %v2007_v52 = vpop.f32.mrb[61].mxu1  ;;  %v2905_v55 = vpack.c.bf16 %v2078_v60, %v2077_v3  ;;  %v2927_v4 = vpack.c.bf16 %v2106_v22, %v2105_v28  ;;  %v2090_v49 = vld [vmem:[#allocation4 + $0x178] sm:$0xff]  ;;  %v2267_v60 = vld [vmem:[#allocation6 + $0x60] sm:$0xff] }
 0x343   :  { %v2025_v51 = vmax.f32 %v2017_v1, %v2021_v8  ;;  %v3020_v25 = vadd.f32 %v2007_v52, %v1781_v16  ;;  %v2039_v62 = vmax.f32 %v2035_v15, 0.0  ;;  %v2907_v16 = vpack.c.bf16 %v2096_v50, %v2095_v20  ;;  %v2100_v1 = vld [vmem:[#allocation4 + $0x1c8] sm:$0xff]  ;;  %v2089_v8 = vld [vmem:[#allocation4 + $0x170] sm:$0xff] }
 0x344   :  { %v2915_v30 = vpack.c.bf16 %v2100_v1, %v2099_v38  ;;  %v2256_v15 = vld [vmem:[#allocation6 + $0x8] sm:$0xff]  ;;  %v2269_v50 = vld [vmem:[#allocation6 + $0x70] sm:$0xff]  ;;  %v2349_v38 = vand.u32 127, %v2348_v39 }
 0x345   :  { %v2022_v10 = vmax.f32 %v3019_v9, %v3020_v25  ;;  %v2011_v48 = vpop.f32.mrb[62].mxu1  ;;  %v2036_v54 = vadd.f32 %v4291_v43, %v2025_v51  ;;  %v2929_v9 = vpack.c.bf16 %v2090_v49, %v2089_v8  ;;  %v2255_v25 = vld [vmem:[#allocation6] sm:$0xff] }
 0x346   :  { %v3021_v12 = vadd.f32 %v2011_v48, %v1785_v56  ;;  %v2013_v35 = vpop.f32.mrb[63].mxu1  ;;  %v2079_v56 = vld [vmem:[#allocation4 + $0x120] sm:$0xff]  ;;  %v2258_v48 = vld [vmem:[#allocation6 + $0x18] sm:$0xff]  ;;  %vm2350_vm5 = vcmp.lt.s32.totalorder %v2349_v38, 10 }
 0x347   :  { %v4295_v31 = vmax.f32 %v2018_v27, %v2022_v10  ;;  %v3022_v26 = vadd.f32 %v2013_v35, %v1787_v59  ;;  %v2040_v42 = vmax.f32 %v2036_v54, 0.0  ;;  %v2909_v63 = vpack.c.bf16 %v2080_v33, %v2079_v56  ;;  %v2101_v27 = vld [vmem:[#allocation4 + $0x1d0] sm:$0xff]  ;;  %v2262_v35 = vld [vmem:[#allocation6 + $0x38] sm:$0xff] }
 0x348   :  { %v2919_v57 = vpack.c.bf16 %v2102_v13, %v2101_v27  ;;  %v2932_v10 = vpack.c.bf16 %v2256_v15, %v2255_v25  ;;  %v2935_v54 = vpack.c.bf16 %v2258_v48, %v2257_v32 }
 0x349   :  { %v2023_v18 = vmax.f32 %v3021_v12, %v3022_v26  ;;  %2178 = vmatprep.mubr.f32.mxu1 %v2040_v42  ;;  %v2037_v52 = vadd.f32 %v4291_v43, %v4295_v31  ;;  %v2938_v12 = vpack.c.bf16 %v2260_v6, %v2259_v5  ;;  %v2263_v26 = vld [vmem:[#allocation6 + $0x40] sm:$0xff]  ;;  %v2264_v42 = vld [vmem:[#allocation6 + $0x48] sm:$0xff] }
 0x34a   :  { %2179 = vmatmul.mubr.f32.vlgmr.msra.gmra.mrb[64].mxu1 %v2039_v62  ;;  %v2265_v62 = vld [vmem:[#allocation6 + $0x50] sm:$0xff] }
 0x34b   :  { %v2027_v14 = vmax.f32 %v2019_v46, %v2023_v18  ;;  %2902 = vmatpush3.bf16.msra.mxu1 %v2901_v47  ;;  %v2086_v46 = vld [vmem:[#allocation4 + $0x158] sm:$0xff]  ;;  %v2041_v51 = vmax.f32 %v2037_v52, 0.0  ;;  %v2944_v47 = vpack.c.bf16 %v2264_v42, %v2263_v26  ;;  %v2268_v18 = vld [vmem:[#allocation6 + $0x68] sm:$0xff] }
 0x34c   :  { %2904 = vmatprep.subr.bf16.mxu1 %v2903_v24  ;;  %v2921_v58 = vpack.c.bf16 %v2086_v46, %v2085_v2  ;;  %v2266_v24 = vld [vmem:[#allocation6 + $0x58] sm:$0xff]  ;;  %v2950_v20 = vpack.c.bf16 %v2268_v18, %v2267_v60 }
 0x34d   :  { %v2038_v59 = vadd.f32 %v4291_v43, %v2027_v14  ;;  %v2261_v43 = vld [vmem:[#allocation6 + $0x30] sm:$0xff]  ;;  %v2947_v3 = vpack.c.bf16 %v2266_v24, %v2265_v62  ;;  %v2270_v14 = vld [vmem:[#allocation6 + $0x78] sm:$0xff] }
 0x34e   :  { %v2941_v31 = vpack.c.bf16 %v2262_v35, %v2261_v43 }
 0x34f   :  { %2906 = vmatpush3.bf16.msra.mxu1 %v2905_v55  ;;  %v2042_v61 = vmax.f32 %v2038_v59, 0.0  ;;  %v2953_v55 = vpack.c.bf16 %v2270_v14, %v2269_v50  ;;  %v2533_v59 = vld [vmem:[%s4316_s6] ss:$0 sm:$0xff] }
 0x350   :  { %2908 = vmatprep.subr.bf16.mxu1 %v2907_v16 }
 0x351   :  { %2248 = vmatprep.mubr.f32.mxu1 %v2042_v61 }
 0x353   :  { %2910 = vmatpush3.bf16.msra.mxu1 %v2909_v63 }
 0x354   :  { %2912 = vmatprep.subr.bf16.mxu1 %v2911_v17 }
 0x357   :  { %2914 = vmatpush3.bf16.msra.mxu1 %v2913_v45 }
 0x358   :  { %2916 = vmatprep.subr.bf16.mxu1 %v2915_v30 }
 0x35b   :  { %2918 = vmatpush3.bf16.msra.mxu1 %v2917_v53 }
 0x35c   :  { %2920 = vmatprep.subr.bf16.mxu1 %v2919_v57 }
 0x35f   :  { %2922 = vmatpush3.bf16.msra.mxu1 %v2921_v58 }
 0x360   :  { %2924 = vmatprep.subr.bf16.mxu1 %v2923_v40 }
 0x363   :  { %2926 = vmatpush3.bf16.msra.mxu1 %v2925_v41 }
 0x364   :  { %2928 = vmatprep.subr.bf16.mxu1 %v2927_v4 }
 0x367   :  { %2930 = vmatpush3.bf16.msra.mxu1 %v2929_v9 }
 0x368   :  { %2931 = vmatprep.subr.bf16.mxu1 %v3277_v29 }
 0x36a   :  { %2249 = vmatmul.mubr.f32.vlgmr.msra.gmra.mrb[66].mxu1 %v2041_v51 }
 0x36b   :  { %2933 = vmatpush3.bf16.msra.mxu1 %v2932_v10  ;;  %2654 = vmatprep.mubr.msk.f32.mxu1 %vm3278_vm4, %v4324_v36  ;;  %v2534_v36 = vld [vmem:[%s4318_s8] ss:$0 sm:$0xff] }
 0x36c   :  { %2934 = vmatprep.subr.bf16.mxu1 %v3277_v29 }
 0x36f   :  { %2936 = vmatpush3.bf16.msra.mxu1 %v2935_v54 }
 0x370   :  { %2937 = vmatprep.subr.bf16.mxu1 %v3277_v29 }
 0x373   :  { %2939 = vmatpush3.bf16.msra.mxu1 %v2938_v12 }
 0x374   :  { %2940 = vmatprep.subr.bf16.mxu1 %v3277_v29 }
 0x377   :  { %2942 = vmatpush3.bf16.msra.mxu1 %v2941_v31 }
 0x378   :  { %2943 = vmatprep.subr.bf16.mxu1 %v3277_v29 }
 0x37b   :  { %2945 = vmatpush3.bf16.msra.mxu1 %v2944_v47 }
 0x37c   :  { %2946 = vmatprep.subr.bf16.mxu1 %v3277_v29 }
 0x37f   :  { %2948 = vmatpush3.bf16.msra.mxu1 %v2947_v3 }
 0x380   :  { %2949 = vmatprep.subr.bf16.mxu1 %v3277_v29 }
 0x383   :  { %2951 = vmatpush3.bf16.msra.mxu1 %v2950_v20 }
 0x384   :  { %2952 = vmatprep.subr.bf16.mxu1 %v3277_v29 }
 0x387   :  { %2954 = vmatpush3.bf16.msra.mxu1 %v2953_v55 }
 0x41d   :  { %v2567_v16 = vpop.f32.mrb[64].mxu1 }
 0x41e   :  { %v2568_v56 = vpop.f32.mrb[65].mxu1 }
 0x41f   :  { %v2569_v33 = vadd.f32 %v2568_v56, %v2567_v16 }
 0x421   :  { %v2181_v61 = vadd.f32 %v2569_v33, %v2533_v59 }
 0x43d   :  { %v2602_v34 = vpop.f32.mrb[66].mxu1 }
 0x43e   :  { %v2603_v37 = vpop.f32.mrb[67].mxu1 }
 0x43f   :  { %v2604_v63 = vadd.f32 %v2603_v37, %v2602_v34 }
 0x441   :  { %v2251_v17 = vadd.f32 %v2604_v63, %v2181_v61 }
 0x443   :  { %v2254_v23 = vmax.f32 %v2251_v17, 0.0 }
 0x445   :  { %2655 = vmatmul.mubr.f32.vlgmr.msra.gmra.mrb[68].mxu1 %v2254_v23 }
 0x518   :  { %v2344_v1 = vpop.f32.mrb[68].mxu1 }
 0x519   :  { %v2345_v45 = vadd.f32 %v2534_v36, %v2344_v1  ;;  %v2656_v30 = vpop.f32.mrb[69].mxu1 }
 0x51b   :  { %v2351_v19 = vsel %vm2350_vm5, %v2345_v45, -1e+30 }
 0x51c   :  { %2352 = vmax.xlane.f32.xlu0 %v2351_v19 }
 0x5a9   :  { %v2353_v44 = vpop.xlane.xlu0 %2352 }
 0x5aa   :  { %v2354_v27 = vsub.f32 %v2351_v19, %v2353_v44 }
 0x5ac   :  { %v2355_v13 = vmul.f32 1.442695, %v2354_v27 }
 0x5ae   :  { %3194 = vpow2.f32 %v2355_v13 }
 0x5b8   :  { %v3195_v53 = vpop.eup %3194 }
 0x5b9   :  { %2357 = vadd.xlane.f32.xlu0 %v3195_v53 }
 0x646   :  { %v2358_v57 = vpop.xlane.xlu0 %2357 }
 0x647   :  { %3196 = vlog2.f32 %v2358_v57 }
 0x651   :  { %v3197_v2 = vpop.eup %3196 }
 0x652   :  { %v2360_v46 = vmul.f32 0.6931472, %v3197_v2 }
 0x654   :  { %v2361_v0 = vsub.f32 %v2354_v27, %v2360_v46 }
 0x656   :  { %2362 = vst [vmem:[%s4319_s9] sm:$0xff] %v2361_v0 }
 0x657   :  { %2367 = vsyncpa [#allocation3], 1 }
 0x658   :  { %2368 = vsyncpa [#allocation5], 1 }

</bundles_post_ra>
